<compile_context>
chip_gen: v7x
topology: tpu7x:2x2x1
jax: 0.10.0
libtpu: 0.0.40
codegen_flags: <defaults>
</compile_context>

<pallas_src>
import functools

import jax
import jax.numpy as jnp
from jax.experimental import pallas as pl
from jax.experimental.pallas import tpu as pltpu


# ---------------------------------------------------------------------------
# Kernel
# ---------------------------------------------------------------------------
def _cross_attention_kernel(
    x_ref, ctx_ref,
    wq_ref, bq_ref, wkv_ref, bkv_ref, wo_ref, bo_ref,
    o_ref,
    kv_ref,         # persistent VMEM scratch (bn, S, 2D) bf16 — K|V cache
    attn_ref,       # VMEM scratch (bn, bt, D) bf16 — per-head attention outs
    *, num_heads: int, head_dim: int,
):
    bn, bt, D = x_ref.shape
    S = ctx_ref.shape[1]
    H, hd = num_heads, head_dim
    cdt = wq_ref.dtype                        # MXU compute dtype (bf16)

    # ---- K/V projection: computed once per batch block.  T is the innermost
    # ("arbitrary") grid axis, so program_id(1) == 0 marks a new batch block;
    # all later T-blocks reuse the cached bf16 K|V from kv_ref.
    @pl.when(pl.program_id(1) == 0)
    def _():
        c2 = ctx_ref[...].reshape(bn * S, D)                       # bf16
        kv = jnp.dot(c2, wkv_ref[...],
                     preferred_element_type=jnp.float32) + bkv_ref[...]
        kv_ref[...] = kv.astype(cdt).reshape(bn, S, 2 * D)

    # ---- Q projection for this (batch, T) block.  1/sqrt(hd) is pre-folded
    # into wq/bq on the host.  Cast to bf16 immediately (short f32 live range).
    x2 = x_ref[...].reshape(bn * bt, D)                            # bf16
    q = jnp.dot(x2, wq_ref[...],
                preferred_element_type=jnp.float32) + bq_ref[...]
    q3 = q.astype(cdt).reshape(bn, bt, D)

    # ---- Per-head attention.  Heads are static lane slices; scores/probs use
    # batched dot_general contracting the last dim of both operands (no
    # explicit transpose); each head result is written into its lane slice of
    # the bf16 scratch (no concatenate).
    for h in range(H):
        lo, hi = h * hd, (h + 1) * hd
        qh = q3[:, :, lo:hi]                                       # (bn, bt, hd)
        kh = kv_ref[:, :, lo:hi]                                   # (bn, S, hd)
        vh = kv_ref[:, :, D + lo:D + hi]                           # (bn, S, hd)

        s = jnp.einsum("bqd,bkd->bqk", qh, kh,
                       preferred_element_type=jnp.float32)         # (bn, bt, S)
        s = s - jnp.max(s, axis=-1, keepdims=True)
        p = jnp.exp(s)
        p = p * pl.reciprocal(jnp.sum(p, axis=-1, keepdims=True), approx=True)

        attn_ref[:, :, lo:hi] = jnp.einsum(
            "bqk,bkd->bqd", p.astype(cdt), vh,
            preferred_element_type=jnp.float32).astype(cdt)

    # ---- Output projection (one full-width matmul over all heads).
    attn2 = attn_ref[...].reshape(bn * bt, D)                      # bf16
    out = jnp.dot(attn2, wo_ref[...],
                  preferred_element_type=jnp.float32) + bo_ref[...]
    o_ref[...] = out.reshape(bn, bt, D).astype(o_ref.dtype)


# ---------------------------------------------------------------------------
# Block sizing / VMEM budgeting
# ---------------------------------------------------------------------------
def _vmem_capacity_bytes():
    try:
        cap = getattr(pltpu.get_tpu_info(), "vmem_capacity_bytes", None)
        if cap:
            return int(cap)
    except Exception:
        pass
    return 64 * 1024 * 1024          # conservative fallback (safe on all gens)


def _legal_seq_blocks(T, align=8):
    opts = [d for d in range(align, T, align) if T % d == 0]
    opts.append(T)                   # full dim is always a legal block
    return sorted(set(opts))


def _pick_seq_block(T, target):
    cands = [b for b in _legal_seq_blocks(T) if b <= target]
    return max(cands) if cands else min(_legal_seq_blocks(T))


def _divisor_at_most(n, cap):
    d = max(1, min(n, cap))
    while n % d:
        d -= 1
    return d


def _vmem_usage_bytes(bn, bt, S, D, single_buffer_weights=True):
    """Rough VMEM footprint estimate for block sizing (bytes)."""
    bf16, f32 = 2, 4
    wbuf = 1 if single_buffer_weights else 2
    weights = wbuf * 4 * D * D * bf16                # wq + wkv(D,2D) + wo
    x_buf = 2 * bn * bt * D * bf16                   # double-buffered X
    ctx_buf = 2 * bn * S * D * bf16                  # double-buffered context
    out_buf = 2 * bn * bt * D * f32                  # double-buffered output
    kv_scr = bn * S * 2 * D * bf16
    attn_scr = bn * bt * D * bf16
    temps = f32 * max(bn * S * 2 * D,                # f32 kv before cast
                      bn * bt * (S + 2 * D))         # scores + q / out proj
    return weights + x_buf + ctx_buf + out_buf + kv_scr + attn_scr + temps


def _choose_blocks(N, T, S, D, budget, vmem_cap):
    # Larger T tiles on v5e/v6e (128 MiB VMEM); stay at 128 on v7x (64 MiB).
    target = 128 if vmem_cap <= 64 * 1024 * 1024 else 256
    bt = _pick_seq_block(T, target)
    bn = _divisor_at_most(N, 8) if (bt % 8 == 0 and S % 8 == 0) else 1
    seq_opts = [b for b in _legal_seq_blocks(T) if b <= bt]
    while _vmem_usage_bytes(bn, bt, S, D) > budget:
        if bn > 1:
            bn = _divisor_at_most(N, max(1, bn // 2))
        elif len(seq_opts) > 1:
            seq_opts.pop()
            bt = seq_opts[-1]
        else:
            break
    return bn, bt


# ---------------------------------------------------------------------------
# Host-side weight prep (hoisted out of the per-forward path — call once)
# ---------------------------------------------------------------------------
def prepare_cross_attention_params(params, *, num_heads,
                                   compute_dtype=jnp.bfloat16):
    """Fold 1/sqrt(head_dim) into Q, fuse K|V, cast weights to bf16."""
    wq_t, bq, wk_t, bk, wv_t, bv, wo_t, bo = params
    D = wq_t.shape[0]
    if D % num_heads:
        raise ValueError("model_dim must be divisible by num_heads")
    inv_scale = 1.0 / (float(D // num_heads) ** 0.5)
    wq = (wq_t * inv_scale).astype(compute_dtype)
    bq2 = (bq * inv_scale).astype(jnp.float32).reshape(1, D)
    wkv = jnp.concatenate([wk_t, wv_t], axis=1).astype(compute_dtype)  # (D, 2D)
    bkv = jnp.concatenate([bk.reshape(1, D), bv.reshape(1, D)],
                          axis=1).astype(jnp.float32)                  # (1, 2D)
    wo = wo_t.astype(compute_dtype)
    bo2 = bo.astype(jnp.float32).reshape(1, D)
    return wq, bq2, wkv, bkv, wo, bo2


# ---------------------------------------------------------------------------
# Wrapper
# ---------------------------------------------------------------------------
def cross_attention(x, context, prepared_params, *, num_heads,
                    context_mask=None, compute_dtype=jnp.bfloat16):
    """x: (N, T, D), context: (N, S, D). Returns (N, T, D) in x.dtype."""
    # TODO(synk): optional context_mask (masked_fill with -inf) is not wired in.
    if context_mask is not None:
        raise NotImplementedError("context_mask is not supported yet")

    N, T, D = x.shape
    S = context.shape[1]
    if D % num_heads:
        raise ValueError("model_dim must be divisible by num_heads")
    head_dim = D // num_heads

    wq, bq, wkv, bkv, wo, bo = prepared_params

    # Generation-aware VMEM budget (≈48 MiB on v7x, ≈96 MiB on v5e/v6e).
    vmem_cap = _vmem_capacity_bytes()
    vmem_limit = int(vmem_cap * 3 // 4)
    block_n, block_t = _choose_blocks(N, T, S, D,
                                      budget=int(vmem_limit * 0.7),
                                      vmem_cap=vmem_cap)
    grid = (N // block_n, T // block_t)

    # bf16 activations: halves HBM->VMEM DMA and the X/context double buffers.
    x_c = x.astype(compute_dtype)
    ctx_c = context.astype(compute_dtype)

    kernel = functools.partial(
        _cross_attention_kernel, num_heads=num_heads, head_dim=head_dim)

    const2 = lambda i, j: (0, 0)

    def build_call(single_buffer_weights):
        if single_buffer_weights:
            # Constant weights are never re-fetched: single-buffer them to
            # halve their VMEM footprint (the dominant consumer at large D).
            def wspec(shape):
                return pl.BlockSpec(shape, const2, pipeline_mode=pl.Buffered(1))
        else:
            def wspec(shape):
                return pl.BlockSpec(shape, const2)

        return pl.pallas_call(
            kernel,
            out_shape=jax.ShapeDtypeStruct((N, T, D), x.dtype),
            grid_spec=pltpu.PrefetchScalarGridSpec(
                num_scalar_prefetch=0,
                grid=grid,
                in_specs=[
                    pl.BlockSpec((block_n, block_t, D),
                                 lambda i, j: (i, j, 0)),   # X (bf16)
                    pl.BlockSpec((block_n, S, D),
                                 lambda i, j: (i, 0, 0)),   # context (bf16)
                    wspec((D, D)),        # W_q (scaled, bf16)
                    wspec((1, D)),        # b_q (scaled, f32)
                    wspec((D, 2 * D)),    # W_k | W_v (bf16)
                    wspec((1, 2 * D)),    # b_k | b_v (f32)
                    wspec((D, D)),        # W_out (bf16)
                    wspec((1, D)),        # b_out (f32)
                ],
                out_specs=pl.BlockSpec((block_n, block_t, D),
                                       lambda i, j: (i, j, 0)),
                scratch_shapes=[
                    pltpu.VMEM((block_n, S, 2 * D), compute_dtype),    # K|V cache
                    pltpu.VMEM((block_n, block_t, D), compute_dtype),  # attn out
                ],
            ),
            compiler_params=pltpu.CompilerParams(
                # Batch axis "parallel" (v7x megacore sharding); T axis
                # "arbitrary" so the K/V cache written at j == 0 is reused
                # across T blocks.
                dimension_semantics=("parallel", "arbitrary"),
                vmem_limit_bytes=vmem_limit,
            ),
        )

    args = (x_c, ctx_c, wq, bq, wkv, bkv, wo, bo)
    try:
        return build_call(True)(*args)
    except Exception:
        # TODO(synk): some JAX versions reject pl.Buffered(1) on pallas_call
        # inputs; fall back to default (double-buffered) weight specs.
        return build_call(False)(*args)


# ---------------------------------------------------------------------------
# Reference + test
# ---------------------------------------------------------------------------
def _reference(x, context, params, *, num_heads):
    """Plain-JAX f32 reference mirroring the PyTorch forward (no mask)."""
    N, T, D = x.shape
    S = context.shape[1]
    hd = D // num_heads
    wq_t, bq, wk_t, bk, wv_t, bv, wo_t, bo = params
    q = x @ wq_t + bq
    k = context @ wk_t + bk
    v = context @ wv_t + bv
    q = q.reshape(N, T, num_heads, hd).transpose(0, 2, 1, 3)
    k = k.reshape(N, S, num_heads, hd).transpose(0, 2, 1, 3)
    v = v.reshape(N, S, num_heads, hd).transpose(0, 2, 1, 3)
    scores = jnp.einsum("nhtd,nhsd->nhts", q, k) / (hd ** 0.5)
    w = jax.nn.softmax(scores, axis=-1)
    out = jnp.einsum("nhts,nhsd->nhtd", w, v)
    out = out.transpose(0, 2, 1, 3).reshape(N, T, D)
    return out @ wo_t + bo


if __name__ == "__main__":
    # Small shapes consistent with the module.
    N, T, S = 2, 8, 8
    model_dim, num_heads = 32, 4

    key = jax.random.PRNGKey(0)
    keys = jax.random.split(key, 10)

    x = jax.random.normal(keys[0], (N, T, model_dim), dtype=jnp.float32)
    context = jax.random.normal(keys[1], (N, S, model_dim), dtype=jnp.float32)

    def linear_init(kw, kb):
        # Deterministic synthetic init (PyTorch-like uniform range).
        bound = 1.0 / (model_dim ** 0.5)
        w_t = jax.random.uniform(kw, (model_dim, model_dim),
                                 minval=-bound, maxval=bound, dtype=jnp.float32)
        b = jax.random.uniform(kb, (1, model_dim),
                               minval=-bound, maxval=bound, dtype=jnp.float32)
        return w_t, b

    wq_t, bq = linear_init(keys[2], keys[3])
    wk_t, bk = linear_init(keys[4], keys[5])
    wv_t, bv = linear_init(keys[6], keys[7])
    wo_t, bo = linear_init(keys[8], keys[9])
    params = (wq_t, bq, wk_t, bk, wv_t, bv, wo_t, bo)

    # Weight prep happens once (hoisted out of the per-forward path).
    prepared = prepare_cross_attention_params(params, num_heads=num_heads)

    out = cross_attention(x, context, prepared, num_heads=num_heads)
    out = jax.block_until_ready(out)

    ref = _reference(x, context, params, num_heads=num_heads)
    max_err = jnp.max(jnp.abs(out - ref))
    assert out.shape == (N, T, model_dim)
    # bf16 MXU operands (f32 accumulation) + approx reciprocal -> bf16-level
    # tolerance vs the f32 reference.
    assert jnp.allclose(out, ref, atol=3e-2, rtol=3e-2), (
        f"max abs err = {max_err}")

    print("KERNEL_OK")
</pallas_src>

<mosaic_0001>
module attributes {stable_mosaic.version = 11 : i64} {
  func.func @_cross_attention_kernel(%arg0: i32, %arg1: i32, %arg2: memref<2x8x32xbf16, #tpu.memory_space<vmem>>, %arg3: memref<2x8x32xbf16, #tpu.memory_space<vmem>>, %arg4: memref<32x32xbf16, #tpu.memory_space<vmem>>, %arg5: memref<1x32xf32, #tpu.memory_space<vmem>>, %arg6: memref<32x64xbf16, #tpu.memory_space<vmem>>, %arg7: memref<1x64xf32, #tpu.memory_space<vmem>>, %arg8: memref<32x32xbf16, #tpu.memory_space<vmem>>, %arg9: memref<1x32xf32, #tpu.memory_space<vmem>>, %arg10: memref<2x8x32xf32, #tpu.memory_space<vmem>>, %arg11: memref<2x8x64xbf16, #tpu.memory_space<vmem>>, %arg12: memref<2x8x32xbf16, #tpu.memory_space<vmem>>) attributes {dimension_semantics = [#tpu.dimension_semantics<parallel>, #tpu.dimension_semantics<arbitrary>], iteration_bounds = array<i64: 1, 1>, scalar_prefetch = 0 : i64, scratch_operands = 2 : i64, tpu.core_type = #tpu.core_type<tc>, window_params = [{transform_indices = @transform_0, window_bounds = array<i64: 2, 8, 32>}, {transform_indices = @transform_1, window_bounds = array<i64: 2, 8, 32>}, {pipeline_mode = #tpu.pipeline_mode<synchronous>, transform_indices = @transform_2, window_bounds = array<i64: 32, 32>}, {pipeline_mode = #tpu.pipeline_mode<synchronous>, transform_indices = @transform_3, window_bounds = array<i64: 1, 32>}, {pipeline_mode = #tpu.pipeline_mode<synchronous>, transform_indices = @transform_4, window_bounds = array<i64: 32, 64>}, {pipeline_mode = #tpu.pipeline_mode<synchronous>, transform_indices = @transform_5, window_bounds = array<i64: 1, 64>}, {pipeline_mode = #tpu.pipeline_mode<synchronous>, transform_indices = @transform_6, window_bounds = array<i64: 32, 32>}, {pipeline_mode = #tpu.pipeline_mode<synchronous>, transform_indices = @transform_7, window_bounds = array<i64: 1, 32>}, {transform_indices = @transform_8, window_bounds = array<i64: 2, 8, 32>}]} {
    %c0_i32 = arith.constant 0 : i32
    %0 = arith.cmpi eq, %arg1, %c0_i32 : i32
    %1 = arith.extui %0 : i1 to i32
    %c0_i32_0 = arith.constant 0 : i32
    %2 = arith.cmpi ne, %1, %c0_i32_0 : i32
    scf.if %2 {
      %c0_63 = arith.constant 0 : index
      %c0_64 = arith.constant 0 : index
      %c0_65 = arith.constant 0 : index
      %93 = vector.load %arg3[%c0_63, %c0_64, %c0_65] : memref<2x8x32xbf16, #tpu.memory_space<vmem>>, vector<2x8x32xbf16>
      %94 = vector.shape_cast %93 : vector<2x8x32xbf16> to vector<16x32xbf16>
      %c0_66 = arith.constant 0 : index
      %c0_67 = arith.constant 0 : index
      %95 = vector.load %arg6[%c0_66, %c0_67] : memref<32x64xbf16, #tpu.memory_space<vmem>>, vector<32x64xbf16>
      %cst_68 = arith.constant dense<0.000000e+00> : vector<16x64xf32>
      %96 = tpu.matmul %94, %95, %cst_68 {dimension_numbers = #tpu.dot_dimension_numbers<[1], [0], [0], [1], [0, 0, 1, 1], [], []>} : vector<16x32xbf16>, vector<32x64xbf16>, vector<16x64xf32> -> vector<16x64xf32>
      %c0_69 = arith.constant 0 : index
      %c0_70 = arith.constant 0 : index
      %97 = vector.load %arg7[%c0_69, %c0_70] : memref<1x64xf32, #tpu.memory_space<vmem>>, vector<1x64xf32>
      %98 = vector.broadcast %97 : vector<1x64xf32> to vector<16x64xf32>
      %99 = arith.addf %96, %98 : vector<16x64xf32>
      %100 = arith.truncf %99 : vector<16x64xf32> to vector<16x64xbf16>
      %101 = vector.shape_cast %100 : vector<16x64xbf16> to vector<2x8x64xbf16>
      %c0_71 = arith.constant 0 : index
      %c0_72 = arith.constant 0 : index
      %c0_73 = arith.constant 0 : index
      %102 = vector.load %arg11[%c0_71, %c0_72, %c0_73] : memref<2x8x64xbf16, #tpu.memory_space<vmem>>, vector<2x8x64xbf16>
      tpu.vector_store %arg11[%c0_71, %c0_72, %c0_73], %101 {strides = array<i32>} : memref<2x8x64xbf16, #tpu.memory_space<vmem>>, vector<2x8x64xbf16>,
    } else {
    }
    %c0 = arith.constant 0 : index
    %c0_1 = arith.constant 0 : index
    %c0_2 = arith.constant 0 : index
    %3 = vector.load %arg2[%c0, %c0_1, %c0_2] : memref<2x8x32xbf16, #tpu.memory_space<vmem>>, vector<2x8x32xbf16>
    %4 = vector.shape_cast %3 : vector<2x8x32xbf16> to vector<16x32xbf16>
    %c0_3 = arith.constant 0 : index
    %c0_4 = arith.constant 0 : index
    %5 = vector.load %arg4[%c0_3, %c0_4] : memref<32x32xbf16, #tpu.memory_space<vmem>>, vector<32x32xbf16>
    %cst = arith.constant dense<0.000000e+00> : vector<16x32xf32>
    %6 = tpu.matmul %4, %5, %cst {dimension_numbers = #tpu.dot_dimension_numbers<[1], [0], [0], [1], [0, 0, 1, 1], [], []>} : vector<16x32xbf16>, vector<32x32xbf16>, vector<16x32xf32> -> vector<16x32xf32>
    %c0_5 = arith.constant 0 : index
    %c0_6 = arith.constant 0 : index
    %7 = vector.load %arg5[%c0_5, %c0_6] : memref<1x32xf32, #tpu.memory_space<vmem>>, vector<1x32xf32>
    %8 = vector.broadcast %7 : vector<1x32xf32> to vector<16x32xf32>
    %9 = arith.addf %6, %8 : vector<16x32xf32>
    %10 = arith.truncf %9 : vector<16x32xf32> to vector<16x32xbf16>
    %11 = vector.shape_cast %10 : vector<16x32xbf16> to vector<2x8x32xbf16>
    %12 = vector.extract_strided_slice %11 {offsets = [0, 0, 0], sizes = [2, 8, 8], strides = [1, 1, 1]} : vector<2x8x32xbf16> to vector<2x8x8xbf16>
    %c0_7 = arith.constant 0 : index
    %c0_8 = arith.constant 0 : index
    %c0_9 = arith.constant 0 : index
    %13 = vector.load %arg11[%c0_7, %c0_8, %c0_9] : memref<2x8x64xbf16, #tpu.memory_space<vmem>>, vector<2x8x8xbf16>
    %c0_10 = arith.constant 0 : index
    %c0_11 = arith.constant 0 : index
    %c32 = arith.constant 32 : index
    %14 = vector.load %arg11[%c0_10, %c0_11, %c32] : memref<2x8x64xbf16, #tpu.memory_space<vmem>>, vector<2x8x8xbf16>
    "tpu.trace_start"() <{level = 10 : i32, message = "bqd,bkd->bqk"}> : () -> ()
    %cst_12 = arith.constant dense<0.000000e+00> : vector<2x8x8xf32>
    %15 = tpu.matmul %12, %13, %cst_12 {dimension_numbers = #tpu.dot_dimension_numbers<[2], [2], [1], [1], [0, 0, 0, 1, 1, 1], [0], [0]>} : vector<2x8x8xbf16>, vector<2x8x8xbf16>, vector<2x8x8xf32> -> vector<2x8x8xf32>
    "tpu.trace_stop"() : () -> ()
    %cst_13 = arith.constant dense<0xFF800000> : vector<2x8xf32>
    %16 = vector.multi_reduction <maximumf>, %15, %cst_13 [2] : vector<2x8x8xf32> to vector<2x8xf32>
    %17 = vector.shape_cast %16 : vector<2x8xf32> to vector<2x8x1xf32>
    %18 = vector.broadcast %17 : vector<2x8x1xf32> to vector<2x8x8xf32>
    %19 = arith.subf %15, %18 : vector<2x8x8xf32>
    %20 = math.exp %19 : vector<2x8x8xf32>
    %cst_14 = arith.constant dense<0.000000e+00> : vector<2x8xf32>
    %21 = vector.multi_reduction <add>, %20, %cst_14 [2] : vector<2x8x8xf32> to vector<2x8xf32>
    %22 = vector.shape_cast %21 : vector<2x8xf32> to vector<2x8x1xf32>
    %23 = tpu.reciprocal %22 {approx = true} : vector<2x8x1xf32> -> vector<2x8x1xf32>
    %24 = vector.broadcast %23 : vector<2x8x1xf32> to vector<2x8x8xf32>
    %25 = arith.mulf %20, %24 : vector<2x8x8xf32>
    %26 = arith.truncf %25 : vector<2x8x8xf32> to vector<2x8x8xbf16>
    "tpu.trace_start"() <{level = 10 : i32, message = "bqk,bkd->bqd"}> : () -> ()
    %cst_15 = arith.constant dense<0.000000e+00> : vector<2x8x8xf32>
    %27 = tpu.matmul %26, %14, %cst_15 {dimension_numbers = #tpu.dot_dimension_numbers<[2], [1], [1], [2], [0, 0, 0, 1, 1, 2], [0], [0]>} : vector<2x8x8xbf16>, vector<2x8x8xbf16>, vector<2x8x8xf32> -> vector<2x8x8xf32>
    "tpu.trace_stop"() : () -> ()
    %28 = arith.truncf %27 : vector<2x8x8xf32> to vector<2x8x8xbf16>
    %c0_16 = arith.constant 0 : index
    %c0_17 = arith.constant 0 : index
    %c0_18 = arith.constant 0 : index
    %29 = vector.load %arg12[%c0_16, %c0_17, %c0_18] : memref<2x8x32xbf16, #tpu.memory_space<vmem>>, vector<2x8x8xbf16>
    tpu.vector_store %arg12[%c0_16, %c0_17, %c0_18], %28 {strides = array<i32>} : memref<2x8x32xbf16, #tpu.memory_space<vmem>>, vector<2x8x8xbf16>,
    %30 = vector.extract_strided_slice %11 {offsets = [0, 0, 8], sizes = [2, 8, 8], strides = [1, 1, 1]} : vector<2x8x32xbf16> to vector<2x8x8xbf16>
    %c0_19 = arith.constant 0 : index
    %c0_20 = arith.constant 0 : index
    %c8 = arith.constant 8 : index
    %31 = vector.load %arg11[%c0_19, %c0_20, %c8] : memref<2x8x64xbf16, #tpu.memory_space<vmem>>, vector<2x8x8xbf16>
    %c0_21 = arith.constant 0 : index
    %c0_22 = arith.constant 0 : index
    %c40 = arith.constant 40 : index
    %32 = vector.load %arg11[%c0_21, %c0_22, %c40] : memref<2x8x64xbf16, #tpu.memory_space<vmem>>, vector<2x8x8xbf16>
    "tpu.trace_start"() <{level = 10 : i32, message = "bqd,bkd->bqk"}> : () -> ()
    %cst_23 = arith.constant dense<0.000000e+00> : vector<2x8x8xf32>
    %33 = tpu.matmul %30, %31, %cst_23 {dimension_numbers = #tpu.dot_dimension_numbers<[2], [2], [1], [1], [0, 0, 0, 1, 1, 1], [0], [0]>} : vector<2x8x8xbf16>, vector<2x8x8xbf16>, vector<2x8x8xf32> -> vector<2x8x8xf32>
    "tpu.trace_stop"() : () -> ()
    %cst_24 = arith.constant dense<0xFF800000> : vector<2x8xf32>
    %34 = vector.multi_reduction <maximumf>, %33, %cst_24 [2] : vector<2x8x8xf32> to vector<2x8xf32>
    %35 = vector.shape_cast %34 : vector<2x8xf32> to vector<2x8x1xf32>
    %36 = vector.broadcast %35 : vector<2x8x1xf32> to vector<2x8x8xf32>
    %37 = arith.subf %33, %36 : vector<2x8x8xf32>
    %38 = math.exp %37 : vector<2x8x8xf32>
    %cst_25 = arith.constant dense<0.000000e+00> : vector<2x8xf32>
    %39 = vector.multi_reduction <add>, %38, %cst_25 [2] : vector<2x8x8xf32> to vector<2x8xf32>
    %40 = vector.shape_cast %39 : vector<2x8xf32> to vector<2x8x1xf32>
    %41 = tpu.reciprocal %40 {approx = true} : vector<2x8x1xf32> -> vector<2x8x1xf32>
    %42 = vector.broadcast %41 : vector<2x8x1xf32> to vector<2x8x8xf32>
    %43 = arith.mulf %38, %42 : vector<2x8x8xf32>
    %44 = arith.truncf %43 : vector<2x8x8xf32> to vector<2x8x8xbf16>
    "tpu.trace_start"() <{level = 10 : i32, message = "bqk,bkd->bqd"}> : () -> ()
    %cst_26 = arith.constant dense<0.000000e+00> : vector<2x8x8xf32>
    %45 = tpu.matmul %44, %32, %cst_26 {dimension_numbers = #tpu.dot_dimension_numbers<[2], [1], [1], [2], [0, 0, 0, 1, 1, 2], [0], [0]>} : vector<2x8x8xbf16>, vector<2x8x8xbf16>, vector<2x8x8xf32> -> vector<2x8x8xf32>
    "tpu.trace_stop"() : () -> ()
    %46 = arith.truncf %45 : vector<2x8x8xf32> to vector<2x8x8xbf16>
    %c0_27 = arith.constant 0 : index
    %c0_28 = arith.constant 0 : index
    %c8_29 = arith.constant 8 : index
    %47 = vector.load %arg12[%c0_27, %c0_28, %c8_29] : memref<2x8x32xbf16, #tpu.memory_space<vmem>>, vector<2x8x8xbf16>
    tpu.vector_store %arg12[%c0_27, %c0_28, %c8_29], %46 {strides = array<i32>} : memref<2x8x32xbf16, #tpu.memory_space<vmem>>, vector<2x8x8xbf16>,
    %48 = vector.extract_strided_slice %11 {offsets = [0, 0, 16], sizes = [2, 8, 8], strides = [1, 1, 1]} : vector<2x8x32xbf16> to vector<2x8x8xbf16>
    %c0_30 = arith.constant 0 : index
    %c0_31 = arith.constant 0 : index
    %c16 = arith.constant 16 : index
    %49 = vector.load %arg11[%c0_30, %c0_31, %c16] : memref<2x8x64xbf16, #tpu.memory_space<vmem>>, vector<2x8x8xbf16>
    %c0_32 = arith.constant 0 : index
    %c0_33 = arith.constant 0 : index
    %c48 = arith.constant 48 : index
    %50 = vector.load %arg11[%c0_32, %c0_33, %c48] : memref<2x8x64xbf16, #tpu.memory_space<vmem>>, vector<2x8x8xbf16>
    "tpu.trace_start"() <{level = 10 : i32, message = "bqd,bkd->bqk"}> : () -> ()
    %cst_34 = arith.constant dense<0.000000e+00> : vector<2x8x8xf32>
    %51 = tpu.matmul %48, %49, %cst_34 {dimension_numbers = #tpu.dot_dimension_numbers<[2], [2], [1], [1], [0, 0, 0, 1, 1, 1], [0], [0]>} : vector<2x8x8xbf16>, vector<2x8x8xbf16>, vector<2x8x8xf32> -> vector<2x8x8xf32>
    "tpu.trace_stop"() : () -> ()
    %cst_35 = arith.constant dense<0xFF800000> : vector<2x8xf32>
    %52 = vector.multi_reduction <maximumf>, %51, %cst_35 [2] : vector<2x8x8xf32> to vector<2x8xf32>
    %53 = vector.shape_cast %52 : vector<2x8xf32> to vector<2x8x1xf32>
    %54 = vector.broadcast %53 : vector<2x8x1xf32> to vector<2x8x8xf32>
    %55 = arith.subf %51, %54 : vector<2x8x8xf32>
    %56 = math.exp %55 : vector<2x8x8xf32>
    %cst_36 = arith.constant dense<0.000000e+00> : vector<2x8xf32>
    %57 = vector.multi_reduction <add>, %56, %cst_36 [2] : vector<2x8x8xf32> to vector<2x8xf32>
    %58 = vector.shape_cast %57 : vector<2x8xf32> to vector<2x8x1xf32>
    %59 = tpu.reciprocal %58 {approx = true} : vector<2x8x1xf32> -> vector<2x8x1xf32>
    %60 = vector.broadcast %59 : vector<2x8x1xf32> to vector<2x8x8xf32>
    %61 = arith.mulf %56, %60 : vector<2x8x8xf32>
    %62 = arith.truncf %61 : vector<2x8x8xf32> to vector<2x8x8xbf16>
    "tpu.trace_start"() <{level = 10 : i32, message = "bqk,bkd->bqd"}> : () -> ()
    %cst_37 = arith.constant dense<0.000000e+00> : vector<2x8x8xf32>
    %63 = tpu.matmul %62, %50, %cst_37 {dimension_numbers = #tpu.dot_dimension_numbers<[2], [1], [1], [2], [0, 0, 0, 1, 1, 2], [0], [0]>} : vector<2x8x8xbf16>, vector<2x8x8xbf16>, vector<2x8x8xf32> -> vector<2x8x8xf32>
    "tpu.trace_stop"() : () -> ()
    %64 = arith.truncf %63 : vector<2x8x8xf32> to vector<2x8x8xbf16>
    %c0_38 = arith.constant 0 : index
    %c0_39 = arith.constant 0 : index
    %c16_40 = arith.constant 16 : index
    %65 = vector.load %arg12[%c0_38, %c0_39, %c16_40] : memref<2x8x32xbf16, #tpu.memory_space<vmem>>, vector<2x8x8xbf16>
    tpu.vector_store %arg12[%c0_38, %c0_39, %c16_40], %64 {strides = array<i32>} : memref<2x8x32xbf16, #tpu.memory_space<vmem>>, vector<2x8x8xbf16>,
    %66 = vector.extract_strided_slice %11 {offsets = [0, 0, 24], sizes = [2, 8, 8], strides = [1, 1, 1]} : vector<2x8x32xbf16> to vector<2x8x8xbf16>
    %c0_41 = arith.constant 0 : index
    %c0_42 = arith.constant 0 : index
    %c24 = arith.constant 24 : index
    %67 = vector.load %arg11[%c0_41, %c0_42, %c24] : memref<2x8x64xbf16, #tpu.memory_space<vmem>>, vector<2x8x8xbf16>
    %c0_43 = arith.constant 0 : index
    %c0_44 = arith.constant 0 : index
    %c56 = arith.constant 56 : index
    %68 = vector.load %arg11[%c0_43, %c0_44, %c56] : memref<2x8x64xbf16, #tpu.memory_space<vmem>>, vector<2x8x8xbf16>
    "tpu.trace_start"() <{level = 10 : i32, message = "bqd,bkd->bqk"}> : () -> ()
    %cst_45 = arith.constant dense<0.000000e+00> : vector<2x8x8xf32>
    %69 = tpu.matmul %66, %67, %cst_45 {dimension_numbers = #tpu.dot_dimension_numbers<[2], [2], [1], [1], [0, 0, 0, 1, 1, 1], [0], [0]>} : vector<2x8x8xbf16>, vector<2x8x8xbf16>, vector<2x8x8xf32> -> vector<2x8x8xf32>
    "tpu.trace_stop"() : () -> ()
    %cst_46 = arith.constant dense<0xFF800000> : vector<2x8xf32>
    %70 = vector.multi_reduction <maximumf>, %69, %cst_46 [2] : vector<2x8x8xf32> to vector<2x8xf32>
    %71 = vector.shape_cast %70 : vector<2x8xf32> to vector<2x8x1xf32>
    %72 = vector.broadcast %71 : vector<2x8x1xf32> to vector<2x8x8xf32>
    %73 = arith.subf %69, %72 : vector<2x8x8xf32>
    %74 = math.exp %73 : vector<2x8x8xf32>
    %cst_47 = arith.constant dense<0.000000e+00> : vector<2x8xf32>
    %75 = vector.multi_reduction <add>, %74, %cst_47 [2] : vector<2x8x8xf32> to vector<2x8xf32>
    %76 = vector.shape_cast %75 : vector<2x8xf32> to vector<2x8x1xf32>
    %77 = tpu.reciprocal %76 {approx = true} : vector<2x8x1xf32> -> vector<2x8x1xf32>
    %78 = vector.broadcast %77 : vector<2x8x1xf32> to vector<2x8x8xf32>
    %79 = arith.mulf %74, %78 : vector<2x8x8xf32>
    %80 = arith.truncf %79 : vector<2x8x8xf32> to vector<2x8x8xbf16>
    "tpu.trace_start"() <{level = 10 : i32, message = "bqk,bkd->bqd"}> : () -> ()
    %cst_48 = arith.constant dense<0.000000e+00> : vector<2x8x8xf32>
    %81 = tpu.matmul %80, %68, %cst_48 {dimension_numbers = #tpu.dot_dimension_numbers<[2], [1], [1], [2], [0, 0, 0, 1, 1, 2], [0], [0]>} : vector<2x8x8xbf16>, vector<2x8x8xbf16>, vector<2x8x8xf32> -> vector<2x8x8xf32>
    "tpu.trace_stop"() : () -> ()
    %82 = arith.truncf %81 : vector<2x8x8xf32> to vector<2x8x8xbf16>
    %c0_49 = arith.constant 0 : index
    %c0_50 = arith.constant 0 : index
    %c24_51 = arith.constant 24 : index
    %83 = vector.load %arg12[%c0_49, %c0_50, %c24_51] : memref<2x8x32xbf16, #tpu.memory_space<vmem>>, vector<2x8x8xbf16>
    tpu.vector_store %arg12[%c0_49, %c0_50, %c24_51], %82 {strides = array<i32>} : memref<2x8x32xbf16, #tpu.memory_space<vmem>>, vector<2x8x8xbf16>,
    %c0_52 = arith.constant 0 : index
    %c0_53 = arith.constant 0 : index
    %c0_54 = arith.constant 0 : index
    %84 = vector.load %arg12[%c0_52, %c0_53, %c0_54] : memref<2x8x32xbf16, #tpu.memory_space<vmem>>, vector<2x8x32xbf16>
    %85 = vector.shape_cast %84 : vector<2x8x32xbf16> to vector<16x32xbf16>
    %c0_55 = arith.constant 0 : index
    %c0_56 = arith.constant 0 : index
    %86 = vector.load %arg8[%c0_55, %c0_56] : memref<32x32xbf16, #tpu.memory_space<vmem>>, vector<32x32xbf16>
    %cst_57 = arith.constant dense<0.000000e+00> : vector<16x32xf32>
    %87 = tpu.matmul %85, %86, %cst_57 {dimension_numbers = #tpu.dot_dimension_numbers<[1], [0], [0], [1], [0, 0, 1, 1], [], []>} : vector<16x32xbf16>, vector<32x32xbf16>, vector<16x32xf32> -> vector<16x32xf32>
    %c0_58 = arith.constant 0 : index
    %c0_59 = arith.constant 0 : index
    %88 = vector.load %arg9[%c0_58, %c0_59] : memref<1x32xf32, #tpu.memory_space<vmem>>, vector<1x32xf32>
    %89 = vector.broadcast %88 : vector<1x32xf32> to vector<16x32xf32>
    %90 = arith.addf %87, %89 : vector<16x32xf32>
    %91 = vector.shape_cast %90 : vector<16x32xf32> to vector<2x8x32xf32>
    %c0_60 = arith.constant 0 : index
    %c0_61 = arith.constant 0 : index
    %c0_62 = arith.constant 0 : index
    %92 = vector.load %arg10[%c0_60, %c0_61, %c0_62] : memref<2x8x32xf32, #tpu.memory_space<vmem>>, vector<2x8x32xf32>
    tpu.vector_store %arg10[%c0_60, %c0_61, %c0_62], %91 {strides = array<i32>} : memref<2x8x32xf32, #tpu.memory_space<vmem>>, vector<2x8x32xf32>,
    return
  }
  func.func @transform_0(%arg0: i32, %arg1: i32) -> (i32, i32, i32) {
    %c0_i32 = arith.constant 0 : i32
    %c0_i32_0 = arith.constant 0 : i32
    return %arg0, %arg1, %c0_i32 : i32, i32, i32
  }
  func.func @transform_1(%arg0: i32, %arg1: i32) -> (i32, i32, i32) {
    %c0_i32 = arith.constant 0 : i32
    %c0_i32_0 = arith.constant 0 : i32
    %c0_i32_1 = arith.constant 0 : i32
    return %arg0, %c0_i32, %c0_i32_0 : i32, i32, i32
  }
  func.func @transform_2(%arg0: i32, %arg1: i32) -> (i32, i32) {
    %c0_i32 = arith.constant 0 : i32
    %c0_i32_0 = arith.constant 0 : i32
    %c0_i32_1 = arith.constant 0 : i32
    return %c0_i32, %c0_i32_0 : i32, i32
  }
  func.func @transform_3(%arg0: i32, %arg1: i32) -> (i32, i32) {
    %c0_i32 = arith.constant 0 : i32
    %c0_i32_0 = arith.constant 0 : i32
    %c0_i32_1 = arith.constant 0 : i32
    return %c0_i32, %c0_i32_0 : i32, i32
  }
  func.func @transform_4(%arg0: i32, %arg1: i32) -> (i32, i32) {
    %c0_i32 = arith.constant 0 : i32
    %c0_i32_0 = arith.constant 0 : i32
    %c0_i32_1 = arith.constant 0 : i32
    return %c0_i32, %c0_i32_0 : i32, i32
  }
  func.func @transform_5(%arg0: i32, %arg1: i32) -> (i32, i32) {
    %c0_i32 = arith.constant 0 : i32
    %c0_i32_0 = arith.constant 0 : i32
    %c0_i32_1 = arith.constant 0 : i32
    return %c0_i32, %c0_i32_0 : i32, i32
  }
  func.func @transform_6(%arg0: i32, %arg1: i32) -> (i32, i32) {
    %c0_i32 = arith.constant 0 : i32
    %c0_i32_0 = arith.constant 0 : i32
    %c0_i32_1 = arith.constant 0 : i32
    return %c0_i32, %c0_i32_0 : i32, i32
  }
  func.func @transform_7(%arg0: i32, %arg1: i32) -> (i32, i32) {
    %c0_i32 = arith.constant 0 : i32
    %c0_i32_0 = arith.constant 0 : i32
    %c0_i32_1 = arith.constant 0 : i32
    return %c0_i32, %c0_i32_0 : i32, i32
  }
  func.func @transform_8(%arg0: i32, %arg1: i32) -> (i32, i32, i32) {
    %c0_i32 = arith.constant 0 : i32
    %c0_i32_0 = arith.constant 0 : i32
    return %arg0, %arg1, %c0_i32 : i32, i32, i32
  }
}

module attributes {stable_mosaic.version = 11 : i64} {
  func.func @_cross_attention_kernel(%arg0: i32, %arg1: i32, %arg2: memref<2x8x32xbf16, #tpu.memory_space<vmem>>, %arg3: memref<2x8x32xbf16, #tpu.memory_space<vmem>>, %arg4: memref<32x32xbf16, #tpu.memory_space<vmem>>, %arg5: memref<1x32xf32, #tpu.memory_space<vmem>>, %arg6: memref<32x64xbf16, #tpu.memory_space<vmem>>, %arg7: memref<1x64xf32, #tpu.memory_space<vmem>>, %arg8: memref<32x32xbf16, #tpu.memory_space<vmem>>, %arg9: memref<1x32xf32, #tpu.memory_space<vmem>>, %arg10: memref<2x8x32xf32, #tpu.memory_space<vmem>>, %arg11: memref<2x8x64xbf16, #tpu.memory_space<vmem>>, %arg12: memref<2x8x32xbf16, #tpu.memory_space<vmem>>) attributes {dimension_semantics = [#tpu.dimension_semantics<parallel>, #tpu.dimension_semantics<arbitrary>], iteration_bounds = array<i64: 1, 1>, scalar_prefetch = 0 : i64, scratch_operands = 2 : i64, tpu.core_type = #tpu.core_type<tc>, window_params = [{transform_indices = @transform_0, window_bounds = array<i64: 2, 8, 32>}, {transform_indices = @transform_1, window_bounds = array<i64: 2, 8, 32>}, {pipeline_mode = #tpu.pipeline_mode<synchronous>, transform_indices = @transform_2, window_bounds = array<i64: 32, 32>}, {pipeline_mode = #tpu.pipeline_mode<synchronous>, transform_indices = @transform_3, window_bounds = array<i64: 1, 32>}, {pipeline_mode = #tpu.pipeline_mode<synchronous>, transform_indices = @transform_4, window_bounds = array<i64: 32, 64>}, {pipeline_mode = #tpu.pipeline_mode<synchronous>, transform_indices = @transform_5, window_bounds = array<i64: 1, 64>}, {pipeline_mode = #tpu.pipeline_mode<synchronous>, transform_indices = @transform_6, window_bounds = array<i64: 32, 32>}, {pipeline_mode = #tpu.pipeline_mode<synchronous>, transform_indices = @transform_7, window_bounds = array<i64: 1, 32>}, {transform_indices = @transform_8, window_bounds = array<i64: 2, 8, 32>}]} {
    %c0_i32 = arith.constant 0 : i32
    %0 = arith.cmpi eq, %arg1, %c0_i32 : i32
    %1 = arith.extui %0 : i1 to i32
    %c0_i32_0 = arith.constant 0 : i32
    %2 = arith.cmpi ne, %1, %c0_i32_0 : i32
    scf.if %2 {
      %c0_63 = arith.constant 0 : index
      %c0_64 = arith.constant 0 : index
      %c0_65 = arith.constant 0 : index
      %93 = vector.load %arg3[%c0_63, %c0_64, %c0_65] : memref<2x8x32xbf16, #tpu.memory_space<vmem>>, vector<2x8x32xbf16>
      %94 = vector.shape_cast %93 : vector<2x8x32xbf16> to vector<16x32xbf16>
      %c0_66 = arith.constant 0 : index
      %c0_67 = arith.constant 0 : index
      %95 = vector.load %arg6[%c0_66, %c0_67] : memref<32x64xbf16, #tpu.memory_space<vmem>>, vector<32x64xbf16>
      %cst_68 = arith.constant dense<0.000000e+00> : vector<16x64xf32>
      %96 = tpu.matmul %94, %95, %cst_68 {dimension_numbers = #tpu.dot_dimension_numbers<[1], [0], [0], [1], [0, 0, 1, 1], [], []>} : vector<16x32xbf16>, vector<32x64xbf16>, vector<16x64xf32> -> vector<16x64xf32>
      %c0_69 = arith.constant 0 : index
      %c0_70 = arith.constant 0 : index
      %97 = vector.load %arg7[%c0_69, %c0_70] : memref<1x64xf32, #tpu.memory_space<vmem>>, vector<1x64xf32>
      %98 = vector.broadcast %97 : vector<1x64xf32> to vector<16x64xf32>
      %99 = arith.addf %96, %98 : vector<16x64xf32>
      %100 = arith.truncf %99 : vector<16x64xf32> to vector<16x64xbf16>
      %101 = vector.shape_cast %100 : vector<16x64xbf16> to vector<2x8x64xbf16>
      %c0_71 = arith.constant 0 : index
      %c0_72 = arith.constant 0 : index
      %c0_73 = arith.constant 0 : index
      %102 = vector.load %arg11[%c0_71, %c0_72, %c0_73] : memref<2x8x64xbf16, #tpu.memory_space<vmem>>, vector<2x8x64xbf16>
      tpu.vector_store %arg11[%c0_71, %c0_72, %c0_73], %101 {strides = array<i32>} : memref<2x8x64xbf16, #tpu.memory_space<vmem>>, vector<2x8x64xbf16>,
    } else {
    }
    %c0 = arith.constant 0 : index
    %c0_1 = arith.constant 0 : index
    %c0_2 = arith.constant 0 : index
    %3 = vector.load %arg2[%c0, %c0_1, %c0_2] : memref<2x8x32xbf16, #tpu.memory_space<vmem>>, vector<2x8x32xbf16>
    %4 = vector.shape_cast %3 : vector<2x8x32xbf16> to vector<16x32xbf16>
    %c0_3 = arith.constant 0 : index
    %c0_4 = arith.constant 0 : index
    %5 = vector.load %arg4[%c0_3, %c0_4] : memref<32x32xbf16, #tpu.memory_space<vmem>>, vector<32x32xbf16>
    %cst = arith.constant dense<0.000000e+00> : vector<16x32xf32>
    %6 = tpu.matmul %4, %5, %cst {dimension_numbers = #tpu.dot_dimension_numbers<[1], [0], [0], [1], [0, 0, 1, 1], [], []>} : vector<16x32xbf16>, vector<32x32xbf16>, vector<16x32xf32> -> vector<16x32xf32>
    %c0_5 = arith.constant 0 : index
    %c0_6 = arith.constant 0 : index
    %7 = vector.load %arg5[%c0_5, %c0_6] : memref<1x32xf32, #tpu.memory_space<vmem>>, vector<1x32xf32>
    %8 = vector.broadcast %7 : vector<1x32xf32> to vector<16x32xf32>
    %9 = arith.addf %6, %8 : vector<16x32xf32>
    %10 = arith.truncf %9 : vector<16x32xf32> to vector<16x32xbf16>
    %11 = vector.shape_cast %10 : vector<16x32xbf16> to vector<2x8x32xbf16>
    %12 = vector.extract_strided_slice %11 {offsets = [0, 0, 0], sizes = [2, 8, 8], strides = [1, 1, 1]} : vector<2x8x32xbf16> to vector<2x8x8xbf16>
    %c0_7 = arith.constant 0 : index
    %c0_8 = arith.constant 0 : index
    %c0_9 = arith.constant 0 : index
    %13 = vector.load %arg11[%c0_7, %c0_8, %c0_9] : memref<2x8x64xbf16, #tpu.memory_space<vmem>>, vector<2x8x8xbf16>
    %c0_10 = arith.constant 0 : index
    %c0_11 = arith.constant 0 : index
    %c32 = arith.constant 32 : index
    %14 = vector.load %arg11[%c0_10, %c0_11, %c32] : memref<2x8x64xbf16, #tpu.memory_space<vmem>>, vector<2x8x8xbf16>
    "tpu.trace_start"() <{level = 10 : i32, message = "bqd,bkd->bqk"}> : () -> ()
    %cst_12 = arith.constant dense<0.000000e+00> : vector<2x8x8xf32>
    %15 = tpu.matmul %12, %13, %cst_12 {dimension_numbers = #tpu.dot_dimension_numbers<[2], [2], [1], [1], [0, 0, 0, 1, 1, 1], [0], [0]>} : vector<2x8x8xbf16>, vector<2x8x8xbf16>, vector<2x8x8xf32> -> vector<2x8x8xf32>
    "tpu.trace_stop"() : () -> ()
    %cst_13 = arith.constant dense<0xFF800000> : vector<2x8xf32>
    %16 = vector.multi_reduction <maximumf>, %15, %cst_13 [2] : vector<2x8x8xf32> to vector<2x8xf32>
    %17 = vector.shape_cast %16 : vector<2x8xf32> to vector<2x8x1xf32>
    %18 = vector.broadcast %17 : vector<2x8x1xf32> to vector<2x8x8xf32>
    %19 = arith.subf %15, %18 : vector<2x8x8xf32>
    %20 = math.exp %19 : vector<2x8x8xf32>
    %cst_14 = arith.constant dense<0.000000e+00> : vector<2x8xf32>
    %21 = vector.multi_reduction <add>, %20, %cst_14 [2] : vector<2x8x8xf32> to vector<2x8xf32>
    %22 = vector.shape_cast %21 : vector<2x8xf32> to vector<2x8x1xf32>
    %23 = tpu.reciprocal %22 {approx = true} : vector<2x8x1xf32> -> vector<2x8x1xf32>
    %24 = vector.broadcast %23 : vector<2x8x1xf32> to vector<2x8x8xf32>
    %25 = arith.mulf %20, %24 : vector<2x8x8xf32>
    %26 = arith.truncf %25 : vector<2x8x8xf32> to vector<2x8x8xbf16>
    "tpu.trace_start"() <{level = 10 : i32, message = "bqk,bkd->bqd"}> : () -> ()
    %cst_15 = arith.constant dense<0.000000e+00> : vector<2x8x8xf32>
    %27 = tpu.matmul %26, %14, %cst_15 {dimension_numbers = #tpu.dot_dimension_numbers<[2], [1], [1], [2], [0, 0, 0, 1, 1, 2], [0], [0]>} : vector<2x8x8xbf16>, vector<2x8x8xbf16>, vector<2x8x8xf32> -> vector<2x8x8xf32>
    "tpu.trace_stop"() : () -> ()
    %28 = arith.truncf %27 : vector<2x8x8xf32> to vector<2x8x8xbf16>
    %c0_16 = arith.constant 0 : index
    %c0_17 = arith.constant 0 : index
    %c0_18 = arith.constant 0 : index
    %29 = vector.load %arg12[%c0_16, %c0_17, %c0_18] : memref<2x8x32xbf16, #tpu.memory_space<vmem>>, vector<2x8x8xbf16>
    tpu.vector_store %arg12[%c0_16, %c0_17, %c0_18], %28 {strides = array<i32>} : memref<2x8x32xbf16, #tpu.memory_space<vmem>>, vector<2x8x8xbf16>,
    %30 = vector.extract_strided_slice %11 {offsets = [0, 0, 8], sizes = [2, 8, 8], strides = [1, 1, 1]} : vector<2x8x32xbf16> to vector<2x8x8xbf16>
    %c0_19 = arith.constant 0 : index
    %c0_20 = arith.constant 0 : index
    %c8 = arith.constant 8 : index
    %31 = vector.load %arg11[%c0_19, %c0_20, %c8] : memref<2x8x64xbf16, #tpu.memory_space<vmem>>, vector<2x8x8xbf16>
    %c0_21 = arith.constant 0 : index
    %c0_22 = arith.constant 0 : index
    %c40 = arith.constant 40 : index
    %32 = vector.load %arg11[%c0_21, %c0_22, %c40] : memref<2x8x64xbf16, #tpu.memory_space<vmem>>, vector<2x8x8xbf16>
    "tpu.trace_start"() <{level = 10 : i32, message = "bqd,bkd->bqk"}> : () -> ()
    %cst_23 = arith.constant dense<0.000000e+00> : vector<2x8x8xf32>
    %33 = tpu.matmul %30, %31, %cst_23 {dimension_numbers = #tpu.dot_dimension_numbers<[2], [2], [1], [1], [0, 0, 0, 1, 1, 1], [0], [0]>} : vector<2x8x8xbf16>, vector<2x8x8xbf16>, vector<2x8x8xf32> -> vector<2x8x8xf32>
    "tpu.trace_stop"() : () -> ()
    %cst_24 = arith.constant dense<0xFF800000> : vector<2x8xf32>
    %34 = vector.multi_reduction <maximumf>, %33, %cst_24 [2] : vector<2x8x8xf32> to vector<2x8xf32>
    %35 = vector.shape_cast %34 : vector<2x8xf32> to vector<2x8x1xf32>
    %36 = vector.broadcast %35 : vector<2x8x1xf32> to vector<2x8x8xf32>
    %37 = arith.subf %33, %36 : vector<2x8x8xf32>
    %38 = math.exp %37 : vector<2x8x8xf32>
    %cst_25 = arith.constant dense<0.000000e+00> : vector<2x8xf32>
    %39 = vector.multi_reduction <add>, %38, %cst_25 [2] : vector<2x8x8xf32> to vector<2x8xf32>
    %40 = vector.shape_cast %39 : vector<2x8xf32> to vector<2x8x1xf32>
    %41 = tpu.reciprocal %40 {approx = true} : vector<2x8x1xf32> -> vector<2x8x1xf32>
    %42 = vector.broadcast %41 : vector<2x8x1xf32> to vector<2x8x8xf32>
    %43 = arith.mulf %38, %42 : vector<2x8x8xf32>
    %44 = arith.truncf %43 : vector<2x8x8xf32> to vector<2x8x8xbf16>
    "tpu.trace_start"() <{level = 10 : i32, message = "bqk,bkd->bqd"}> : () -> ()
    %cst_26 = arith.constant dense<0.000000e+00> : vector<2x8x8xf32>
    %45 = tpu.matmul %44, %32, %cst_26 {dimension_numbers = #tpu.dot_dimension_numbers<[2], [1], [1], [2], [0, 0, 0, 1, 1, 2], [0], [0]>} : vector<2x8x8xbf16>, vector<2x8x8xbf16>, vector<2x8x8xf32> -> vector<2x8x8xf32>
    "tpu.trace_stop"() : () -> ()
    %46 = arith.truncf %45 : vector<2x8x8xf32> to vector<2x8x8xbf16>
    %c0_27 = arith.constant 0 : index
    %c0_28 = arith.constant 0 : index
    %c8_29 = arith.constant 8 : index
    %47 = vector.load %arg12[%c0_27, %c0_28, %c8_29] : memref<2x8x32xbf16, #tpu.memory_space<vmem>>, vector<2x8x8xbf16>
    tpu.vector_store %arg12[%c0_27, %c0_28, %c8_29], %46 {strides = array<i32>} : memref<2x8x32xbf16, #tpu.memory_space<vmem>>, vector<2x8x8xbf16>,
    %48 = vector.extract_strided_slice %11 {offsets = [0, 0, 16], sizes = [2, 8, 8], strides = [1, 1, 1]} : vector<2x8x32xbf16> to vector<2x8x8xbf16>
    %c0_30 = arith.constant 0 : index
    %c0_31 = arith.constant 0 : index
    %c16 = arith.constant 16 : index
    %49 = vector.load %arg11[%c0_30, %c0_31, %c16] : memref<2x8x64xbf16, #tpu.memory_space<vmem>>, vector<2x8x8xbf16>
    %c0_32 = arith.constant 0 : index
    %c0_33 = arith.constant 0 : index
    %c48 = arith.constant 48 : index
    %50 = vector.load %arg11[%c0_32, %c0_33, %c48] : memref<2x8x64xbf16, #tpu.memory_space<vmem>>, vector<2x8x8xbf16>
    "tpu.trace_start"() <{level = 10 : i32, message = "bqd,bkd->bqk"}> : () -> ()
    %cst_34 = arith.constant dense<0.000000e+00> : vector<2x8x8xf32>
    %51 = tpu.matmul %48, %49, %cst_34 {dimension_numbers = #tpu.dot_dimension_numbers<[2], [2], [1], [1], [0, 0, 0, 1, 1, 1], [0], [0]>} : vector<2x8x8xbf16>, vector<2x8x8xbf16>, vector<2x8x8xf32> -> vector<2x8x8xf32>
    "tpu.trace_stop"() : () -> ()
    %cst_35 = arith.constant dense<0xFF800000> : vector<2x8xf32>
    %52 = vector.multi_reduction <maximumf>, %51, %cst_35 [2] : vector<2x8x8xf32> to vector<2x8xf32>
    %53 = vector.shape_cast %52 : vector<2x8xf32> to vector<2x8x1xf32>
    %54 = vector.broadcast %53 : vector<2x8x1xf32> to vector<2x8x8xf32>
    %55 = arith.subf %51, %54 : vector<2x8x8xf32>
    %56 = math.exp %55 : vector<2x8x8xf32>
    %cst_36 = arith.constant dense<0.000000e+00> : vector<2x8xf32>
    %57 = vector.multi_reduction <add>, %56, %cst_36 [2] : vector<2x8x8xf32> to vector<2x8xf32>
    %58 = vector.shape_cast %57 : vector<2x8xf32> to vector<2x8x1xf32>
    %59 = tpu.reciprocal %58 {approx = true} : vector<2x8x1xf32> -> vector<2x8x1xf32>
    %60 = vector.broadcast %59 : vector<2x8x1xf32> to vector<2x8x8xf32>
    %61 = arith.mulf %56, %60 : vector<2x8x8xf32>
    %62 = arith.truncf %61 : vector<2x8x8xf32> to vector<2x8x8xbf16>
    "tpu.trace_start"() <{level = 10 : i32, message = "bqk,bkd->bqd"}> : () -> ()
    %cst_37 = arith.constant dense<0.000000e+00> : vector<2x8x8xf32>
    %63 = tpu.matmul %62, %50, %cst_37 {dimension_numbers = #tpu.dot_dimension_numbers<[2], [1], [1], [2], [0, 0, 0, 1, 1, 2], [0], [0]>} : vector<2x8x8xbf16>, vector<2x8x8xbf16>, vector<2x8x8xf32> -> vector<2x8x8xf32>
    "tpu.trace_stop"() : () -> ()
    %64 = arith.truncf %63 : vector<2x8x8xf32> to vector<2x8x8xbf16>
    %c0_38 = arith.constant 0 : index
    %c0_39 = arith.constant 0 : index
    %c16_40 = arith.constant 16 : index
    %65 = vector.load %arg12[%c0_38, %c0_39, %c16_40] : memref<2x8x32xbf16, #tpu.memory_space<vmem>>, vector<2x8x8xbf16>
    tpu.vector_store %arg12[%c0_38, %c0_39, %c16_40], %64 {strides = array<i32>} : memref<2x8x32xbf16, #tpu.memory_space<vmem>>, vector<2x8x8xbf16>,
    %66 = vector.extract_strided_slice %11 {offsets = [0, 0, 24], sizes = [2, 8, 8], strides = [1, 1, 1]} : vector<2x8x32xbf16> to vector<2x8x8xbf16>
    %c0_41 = arith.constant 0 : index
    %c0_42 = arith.constant 0 : index
    %c24 = arith.constant 24 : index
    %67 = vector.load %arg11[%c0_41, %c0_42, %c24] : memref<2x8x64xbf16, #tpu.memory_space<vmem>>, vector<2x8x8xbf16>
    %c0_43 = arith.constant 0 : index
    %c0_44 = arith.constant 0 : index
    %c56 = arith.constant 56 : index
    %68 = vector.load %arg11[%c0_43, %c0_44, %c56] : memref<2x8x64xbf16, #tpu.memory_space<vmem>>, vector<2x8x8xbf16>
    "tpu.trace_start"() <{level = 10 : i32, message = "bqd,bkd->bqk"}> : () -> ()
    %cst_45 = arith.constant dense<0.000000e+00> : vector<2x8x8xf32>
    %69 = tpu.matmul %66, %67, %cst_45 {dimension_numbers = #tpu.dot_dimension_numbers<[2], [2], [1], [1], [0, 0, 0, 1, 1, 1], [0], [0]>} : vector<2x8x8xbf16>, vector<2x8x8xbf16>, vector<2x8x8xf32> -> vector<2x8x8xf32>
    "tpu.trace_stop"() : () -> ()
    %cst_46 = arith.constant dense<0xFF800000> : vector<2x8xf32>
    %70 = vector.multi_reduction <maximumf>, %69, %cst_46 [2] : vector<2x8x8xf32> to vector<2x8xf32>
    %71 = vector.shape_cast %70 : vector<2x8xf32> to vector<2x8x1xf32>
    %72 = vector.broadcast %71 : vector<2x8x1xf32> to vector<2x8x8xf32>
    %73 = arith.subf %69, %72 : vector<2x8x8xf32>
    %74 = math.exp %73 : vector<2x8x8xf32>
    %cst_47 = arith.constant dense<0.000000e+00> : vector<2x8xf32>
    %75 = vector.multi_reduction <add>, %74, %cst_47 [2] : vector<2x8x8xf32> to vector<2x8xf32>
    %76 = vector.shape_cast %75 : vector<2x8xf32> to vector<2x8x1xf32>
    %77 = tpu.reciprocal %76 {approx = true} : vector<2x8x1xf32> -> vector<2x8x1xf32>
    %78 = vector.broadcast %77 : vector<2x8x1xf32> to vector<2x8x8xf32>
    %79 = arith.mulf %74, %78 : vector<2x8x8xf32>
    %80 = arith.truncf %79 : vector<2x8x8xf32> to vector<2x8x8xbf16>
    "tpu.trace_start"() <{level = 10 : i32, message = "bqk,bkd->bqd"}> : () -> ()
    %cst_48 = arith.constant dense<0.000000e+00> : vector<2x8x8xf32>
    %81 = tpu.matmul %80, %68, %cst_48 {dimension_numbers = #tpu.dot_dimension_numbers<[2], [1], [1], [2], [0, 0, 0, 1, 1, 2], [0], [0]>} : vector<2x8x8xbf16>, vector<2x8x8xbf16>, vector<2x8x8xf32> -> vector<2x8x8xf32>
    "tpu.trace_stop"() : () -> ()
    %82 = arith.truncf %81 : vector<2x8x8xf32> to vector<2x8x8xbf16>
    %c0_49 = arith.constant 0 : index
    %c0_50 = arith.constant 0 : index
    %c24_51 = arith.constant 24 : index
    %83 = vector.load %arg12[%c0_49, %c0_50, %c24_51] : memref<2x8x32xbf16, #tpu.memory_space<vmem>>, vector<2x8x8xbf16>
    tpu.vector_store %arg12[%c0_49, %c0_50, %c24_51], %82 {strides = array<i32>} : memref<2x8x32xbf16, #tpu.memory_space<vmem>>, vector<2x8x8xbf16>,
    %c0_52 = arith.constant 0 : index
    %c0_53 = arith.constant 0 : index
    %c0_54 = arith.constant 0 : index
    %84 = vector.load %arg12[%c0_52, %c0_53, %c0_54] : memref<2x8x32xbf16, #tpu.memory_space<vmem>>, vector<2x8x32xbf16>
    %85 = vector.shape_cast %84 : vector<2x8x32xbf16> to vector<16x32xbf16>
    %c0_55 = arith.constant 0 : index
    %c0_56 = arith.constant 0 : index
    %86 = vector.load %arg8[%c0_55, %c0_56] : memref<32x32xbf16, #tpu.memory_space<vmem>>, vector<32x32xbf16>
    %cst_57 = arith.constant dense<0.000000e+00> : vector<16x32xf32>
    %87 = tpu.matmul %85, %86, %cst_57 {dimension_numbers = #tpu.dot_dimension_numbers<[1], [0], [0], [1], [0, 0, 1, 1], [], []>} : vector<16x32xbf16>, vector<32x32xbf16>, vector<16x32xf32> -> vector<16x32xf32>
    %c0_58 = arith.constant 0 : index
    %c0_59 = arith.constant 0 : index
    %88 = vector.load %arg9[%c0_58, %c0_59] : memref<1x32xf32, #tpu.memory_space<vmem>>, vector<1x32xf32>
    %89 = vector.broadcast %88 : vector<1x32xf32> to vector<16x32xf32>
    %90 = arith.addf %87, %89 : vector<16x32xf32>
    %91 = vector.shape_cast %90 : vector<16x32xf32> to vector<2x8x32xf32>
    %c0_60 = arith.constant 0 : index
    %c0_61 = arith.constant 0 : index
    %c0_62 = arith.constant 0 : index
    %92 = vector.load %arg10[%c0_60, %c0_61, %c0_62] : memref<2x8x32xf32, #tpu.memory_space<vmem>>, vector<2x8x32xf32>
    tpu.vector_store %arg10[%c0_60, %c0_61, %c0_62], %91 {strides = array<i32>} : memref<2x8x32xf32, #tpu.memory_space<vmem>>, vector<2x8x32xf32>,
    return
  }
  func.func @transform_0(%arg0: i32, %arg1: i32) -> (i32, i32, i32) {
    %c0_i32 = arith.constant 0 : i32
    %c0_i32_0 = arith.constant 0 : i32
    return %arg0, %arg1, %c0_i32 : i32, i32, i32
  }
  func.func @transform_1(%arg0: i32, %arg1: i32) -> (i32, i32, i32) {
    %c0_i32 = arith.constant 0 : i32
    %c0_i32_0 = arith.constant 0 : i32
    %c0_i32_1 = arith.constant 0 : i32
    return %arg0, %c0_i32, %c0_i32_0 : i32, i32, i32
  }
  func.func @transform_2(%arg0: i32, %arg1: i32) -> (i32, i32) {
    %c0_i32 = arith.constant 0 : i32
    %c0_i32_0 = arith.constant 0 : i32
    %c0_i32_1 = arith.constant 0 : i32
    return %c0_i32, %c0_i32_0 : i32, i32
  }
  func.func @transform_3(%arg0: i32, %arg1: i32) -> (i32, i32) {
    %c0_i32 = arith.constant 0 : i32
    %c0_i32_0 = arith.constant 0 : i32
    %c0_i32_1 = arith.constant 0 : i32
    return %c0_i32, %c0_i32_0 : i32, i32
  }
  func.func @transform_4(%arg0: i32, %arg1: i32) -> (i32, i32) {
    %c0_i32 = arith.constant 0 : i32
    %c0_i32_0 = arith.constant 0 : i32
    %c0_i32_1 = arith.constant 0 : i32
    return %c0_i32, %c0_i32_0 : i32, i32
  }
  func.func @transform_5(%arg0: i32, %arg1: i32) -> (i32, i32) {
    %c0_i32 = arith.constant 0 : i32
    %c0_i32_0 = arith.constant 0 : i32
    %c0_i32_1 = arith.constant 0 : i32
    return %c0_i32, %c0_i32_0 : i32, i32
  }
  func.func @transform_6(%arg0: i32, %arg1: i32) -> (i32, i32) {
    %c0_i32 = arith.constant 0 : i32
    %c0_i32_0 = arith.constant 0 : i32
    %c0_i32_1 = arith.constant 0 : i32
    return %c0_i32, %c0_i32_0 : i32, i32
  }
  func.func @transform_7(%arg0: i32, %arg1: i32) -> (i32, i32) {
    %c0_i32 = arith.constant 0 : i32
    %c0_i32_0 = arith.constant 0 : i32
    %c0_i32_1 = arith.constant 0 : i32
    return %c0_i32, %c0_i32_0 : i32, i32
  }
  func.func @transform_8(%arg0: i32, %arg1: i32) -> (i32, i32, i32) {
    %c0_i32 = arith.constant 0 : i32
    %c0_i32_0 = arith.constant 0 : i32
    return %arg0, %arg1, %c0_i32 : i32, i32, i32
  }
}

</mosaic_0001>

<bundles_post_ra>
// kernel: tpu_custom_call.1
= control target key start
LH: loop header
LB: loop body
LE: loop exit
PB: predicated region body
PF: predicated region fallthrough
CT: control target
= control target key end

     0   :  { %13 = vsyncpa [#allocation5], 0  ;;  %s2051_s0 = inlined_call_operand.hbm [shape: bf16[2,8,32], index: 0, kind: input, shape index: {}]   ;;  %s2052_s1 = inlined_call_operand.hbm [shape: bf16[2,8,32], index: 1, kind: input, shape index: {}]   ;;  %s2053_s2 = inlined_call_operand.hbm [shape: bf16[32,32], index: 2, kind: input, shape index: {}]   ;;  %s2054_s3 = inlined_call_operand.vmem [shape: f32[1,32], index: 3, kind: input, shape index: {}]   ;;  %s2055_s4 = inlined_call_operand.hbm [shape: bf16[32,64], index: 4, kind: input, shape index: {}]   ;;  %s2056_s5 = inlined_call_operand.vmem [shape: f32[1,64], index: 5, kind: input, shape index: {}]   ;;  %s2057_s6 = inlined_call_operand.vmem [shape: bf16[32,32], index: 6, kind: input, shape index: {}]   ;;  %s2058_s7 = inlined_call_operand.vmem [shape: f32[1,32], index: 7, kind: input, shape index: {}]   ;;  %s2059_s8 = inlined_call_operand.hbm [shape: f32[2,8,32], index: 8, kind: output, shape index: {}]  }
   0x1   :  { %14 = vsyncpa [#allocation8], 0 }
   0x2   :  { %15 = vsyncpa [#allocation11], 0 }
   0x3   :  { %16 = vsyncpa [#allocation6], 0  ;;  %s1721_s27 = smov [#allocation7]   ;;  %s1722_s29 = smov [#allocation4]  }
   0x4   :  { %s34_s28 = sshll.u32 %s1721_s27, 4  ;;  %s22_s30 = sshll.u32 %s1722_s29, 4  ;;  %s35_s28 = int_to_ptr.vmem [resolvable:$true] %s34_s28  ;;  %s1786_s30 = int_to_ptr.vmem [resolvable:$true] %s22_s30 }
   0x5   :  { %s1603_s11 = scalar_lea.hbm %s2052_s1, 128 }
   0x6   :  { %p1604_p0 = scmp.ne.s32.totalorder %s2052_s1, %s1603_s11  ;;  %p1607_p1 = scmp.lt.u32.totalorder %s1603_s11, %s2052_s1 }
   0x8   :  { %p1609_p2 = pnand %p1607_p1, %p1604_p0 }
   0xa   :  { %1612 = shalt.err (!%p1609_p2)
}
   0xb   :  { %s1613_s16 = scalar_lea.vmem %s35_s28, 128  ;;  %p1618_p4 = scmp.lt.s32.totalorder %s35_s28, %s35_s28 }
   0xc   :  { %p1614_p3 = scmp.ne.s32.totalorder %s35_s28, %s1613_s16  ;;  %p1619_p5 = scmp.lt.s32.totalorder %s1613_s16, %s1613_s16 }
   0xe   :  { %p1620_p6 = por %p1619_p5, %p1618_p4 }
  0x10   :  { %p1621_p7 = pnand %p1620_p6, %p1614_p3 }
  0x12   :  { %1624 = shalt.err (!%p1621_p7)
}
  0x13   :  { %s1723_s17 = smov 64   ;;  %s1724_s18 = smov 4  }
  0x14   :  { %40 = dma.hbm_to_vmem [thread:$0]  %s2052_s1, 128, %s35_s28, [#allocation8], %s1723_s17, %s1723_s17, %s1724_s18  }
  0x15   :  { %s1625_s23 = scalar_lea.hbm %s2051_s0, 128 }
  0x16   :  { %p1626_p8 = scmp.ne.s32.totalorder %s2051_s0, %s1625_s23  ;;  %p1629_p9 = scmp.lt.u32.totalorder %s1625_s23, %s2051_s0 }
  0x18   :  { %p1631_p10 = pnand %p1629_p9, %p1626_p8 }
  0x1a   :  { %1634 = shalt.err (!%p1631_p10)
}
  0x1b   :  { %s1635_s29 = scalar_lea.vmem %s1786_s30, 128  ;;  %p1640_p12 = scmp.lt.s32.totalorder %s1786_s30, %s1786_s30 }
  0x1c   :  { %p1636_p11 = scmp.ne.s32.totalorder %s1786_s30, %s1635_s29  ;;  %p1641_p13 = scmp.lt.s32.totalorder %s1635_s29, %s1635_s29 }
  0x1e   :  { %p1642_p0 = por %p1641_p13, %p1640_p12 }
  0x20   :  { %p1643_p1 = pnand %p1642_p0, %p1636_p11 }
  0x22   :  { %1646 = shalt.err (!%p1643_p1)
}
  0x23   :  { %28 = dma.hbm_to_vmem [thread:$0]  %s2051_s0, 128, %s1786_s30, [#allocation5], %s1723_s17, %s1723_s17, %s1724_s18  }
  0x24   :  { %s1725_s9 = smov [#allocation9]   ;;  %s1726_s11 = smov [#allocation10]  }
  0x25   :  { %s46_s10 = sshll.u32 %s1725_s9, 4  ;;  %s60_s12 = sshll.u32 %s1726_s11, 4  ;;  %s47_s10 = int_to_ptr.vmem [resolvable:$true] %s46_s10  ;;  %s1823_s12 = int_to_ptr.vmem [resolvable:$true] %s60_s12 }
  0x26   :  { %s1647_s15 = scalar_lea.hbm %s2053_s2, 256 }
  0x27   :  { %p1648_p2 = scmp.ne.s32.totalorder %s2053_s2, %s1647_s15  ;;  %p1651_p3 = scmp.lt.u32.totalorder %s1647_s15, %s2053_s2 }
  0x29   :  { %p1653_p4 = pnand %p1651_p3, %p1648_p2 }
  0x2b   :  { %1656 = shalt.err (!%p1653_p4)
}
  0x2c   :  { %s1657_s0 = scalar_lea.vmem %s47_s10, 256  ;;  %p1662_p6 = scmp.lt.s32.totalorder %s47_s10, %s47_s10 }
  0x2d   :  { %p1658_p5 = scmp.ne.s32.totalorder %s47_s10, %s1657_s0  ;;  %p1663_p7 = scmp.lt.s32.totalorder %s1657_s0, %s1657_s0 }
  0x2f   :  { %p1664_p8 = por %p1663_p7, %p1662_p6 }
  0x31   :  { %p1665_p9 = pnand %p1664_p8, %p1658_p5 }
  0x33   :  { %1668 = shalt.err (!%p1665_p9)
}
  0x34   :  { %52 = dma.hbm_to_vmem [thread:$0]  %s2053_s2, 256, %s47_s10, [#allocation8], %s1723_s17, %s1723_s17, %s1724_s18  }
  0x35   :  { %s1669_s25 = scalar_lea.hbm %s2055_s4, 256 }
  0x36   :  { %p1670_p10 = scmp.ne.s32.totalorder %s2055_s4, %s1669_s25  ;;  %p1673_p11 = scmp.lt.u32.totalorder %s1669_s25, %s2055_s4 }
  0x38   :  { %p1675_p12 = pnand %p1673_p11, %p1670_p10 }
  0x3a   :  { %1678 = shalt.err (!%p1675_p12)
}
  0x3b   :  { %s1679_s28 = scalar_lea.vmem %s1823_s12, 256  ;;  %p1684_p0 = scmp.lt.s32.totalorder %s1823_s12, %s1823_s12 }
  0x3c   :  { %p1680_p13 = scmp.ne.s32.totalorder %s1823_s12, %s1679_s28  ;;  %p1685_p1 = scmp.lt.s32.totalorder %s1679_s28, %s1679_s28 }
  0x3e   :  { %p1686_p2 = por %p1685_p1, %p1684_p0 }
  0x40   :  { %p1687_p3 = pnand %p1686_p2, %p1680_p13 }
  0x42   :  { %1690 = shalt.err (!%p1687_p3)
}
  0x43   :  { %66 = dma.hbm_to_vmem [thread:$0]  %s2055_s4, 256, %s1823_s12, [#allocation11], %s1723_s17, %s1723_s17, %s1724_s18  }
  0x44   :  { %1713 = dma.done.wait [#allocation5], 128  }
  0x45   :  { %1714 = vsyncadd [#allocation5], 4294967168 }
  0x46   :  { %1715 = dma.done.wait [#allocation8], 384  }
  0x47   :  { %1716 = vsyncadd [#allocation8], 4294966912 }
  0x48   :  { %1717 = dma.done.wait [#allocation11], 256  }
  0x49   :  { %1718 = vsyncadd [#allocation11], 4294967040  ;;  %v1727_v0 = vmov 0.0   ;;  %vm1728_vm0 = vmmov 0   ;;  %v1554_v1 = vld [vmem:[#allocation10] sm:$0xff]   ;;  %v1555_v2 = vld [vmem:[#allocation10 + $0x8] sm:$0xff]  }
  0x4a   :  { %1414 = vmatprep.subr.bf16.mxu0 %v1727_v0  ;;  %1418 = vmatprep.mubr.msk.bf16.mxu0 %vm1728_vm0, %v1727_v0  ;;  %v1557_v3 = vld [vmem:[#allocation9] sm:$0xff]   ;;  %v1556_v4 = vld [vmem:[#allocation7] sm:$0xff]   ;;  %v1558_v5 = vld [vmem:[#allocation9 + $0x8] sm:$0xff]   ;;  %vm120_vm1 = vcmask 261120   ;;  %vm173_vm2 = vcmask 519168   ;;  %vm259_vm3 = vcmask 64512  }
  0x4b   :  { %1422 = vmatprep.subr.bf16.mxu1 %v1727_v0  ;;  %1426 = vmatprep.mubr.msk.bf16.mxu1 %vm1728_vm0, %v1727_v0  ;;  %v1559_v6 = vld [vmem:[#allocation4] sm:$0xff]   ;;  %vm384_vm4 = vcmask 1043456   ;;  %vm481_vm5 = vcmask 60416   ;;  %s1731_s11 = smov 88   ;;  %s1732_s12 = smov 112   ;;  %vm726_vm6 = vcmask 126016  }
  0x4c   :  { %1415 = vmatpush3.bf16.msra.mxu0 %v1554_v1  ;;  %1423 = vmatpush3.bf16.msra.mxu1 %v1557_v3  ;;  %v1314_v7 = vld [vmem:[%s2056_s5] ss:$0 sm:$0xff]  ;;  %s1729_s5 = smov 96   ;;  %s1733_s13 = smov 80   ;;  %vm971_vm7 = vcmask 191616   ;;  %vm1216_vm8 = vcmask 257216  }
  0x4d   :  { %1416 = vmatprep.subr.bf16.mxu0 %v1727_v0  ;;  %1424 = vmatprep.subr.bf16.mxu1 %v1727_v0  ;;  %v1321_v20 = vld [vmem:[%s2054_s3] ss:$0 sm:$0xff]  ;;  %s1730_s3 = smov 120   ;;  %s1734_s14 = smov 104  }
  0x4e   :  { %s1735_s15 = smov 72   ;;  %s1736_s16 = smov 8  }
  0x4f   :  { %s1737_s19 = smov 16   ;;  %s1738_s22 = smov 24  }
  0x50   :  { %1417 = vmatpush3.bf16.msra.mxu0 %v1555_v2  ;;  %1425 = vmatpush3.bf16.msra.mxu1 %v1558_v5  ;;  %s1739_s24 = smov [#allocation12]  }
  0x51   :  { %1430 = vmatprep.subr.bf16.mxu0 %v1727_v0  ;;  %1436 = vmatprep.subr.bf16.mxu1 %v1727_v0  ;;  %s1300_s25 = sshll.u32 %s1739_s24, 4  ;;  %s1301_s25 = int_to_ptr.vmem [resolvable:$true] %s1300_s25 }
  0x52   :  { %s1691_s26 = scalar_lea.vmem %s1301_s25, 256  ;;  %p1696_p5 = scmp.lt.s32.totalorder %s1301_s25, %s1301_s25 }
  0x53   :  { %1419 = vmatmul.mubr.msk.bf16.vlgmr.msra.gmra.mrb[0].mxu0 %vm120_vm1, %v1556_v4  ;;  %1427 = vmatmul.mubr.msk.bf16.vlgmr.msra.gmra.mrb[0].mxu1 %vm120_vm1, %v1559_v6  ;;  %p1692_p4 = scmp.ne.s32.totalorder %s1301_s25, %s1691_s26  ;;  %p1697_p6 = scmp.lt.s32.totalorder %s1691_s26, %s1691_s26 }
  0x54   :  { %1432 = vmatprep.mubr.msk.bf16.mxu0 %vm1728_vm0, %v1727_v0  ;;  %1438 = vmatprep.mubr.msk.bf16.mxu1 %vm1728_vm0, %v1727_v0 }
  0x55   :  { %p1698_p7 = por %p1697_p6, %p1696_p5 }
  0x57   :  { %p1699_p8 = pnand %p1698_p7, %p1692_p4 }
 0x126   :  { %v158_v8 = vpop.f32.mrb[0].mxu0  ;;  %v244_v15 = vpop.f32.mrb[0].mxu1 }
 0x127   :  { %v159_v9 = vadd.f32 %v1314_v7, %v158_v8  ;;  %v1420_v10 = vpop.f32.mrb[1].mxu0  ;;  %v1428_v16 = vpop.f32.mrb[1].mxu1  ;;  %v245_v22 = vadd.f32 %v1321_v20, %v244_v15 }
 0x128   :  { %v161_v11 = vpop.f32.mrb[2].mxu0  ;;  %v247_v18 = vpop.f32.mrb[2].mxu1 }
 0x129   :  { %v1363_v12 = vpack.c.bf16 %v159_v9, %v159_v9  ;;  %v162_v13 = vadd.f32 %v1314_v7, %v161_v11  ;;  %v1421_v14 = vpop.f32.mrb[3].mxu0  ;;  %v1429_v19 = vpop.f32.mrb[3].mxu1  ;;  %v1885_v27 = vpack.c.bf16 %v245_v22, %v245_v22  ;;  %v248_v28 = vadd.f32 %v1321_v20, %v247_v18 }
 0x12b   :  { %174 = vst.msk [vmem:[#allocation2] sm:$0xf] %vm173_vm2, %v1363_v12  ;;  %v1364_v17 = vpack.c.bf16 %v162_v13, %v162_v13  ;;  %v1890_v30 = vpack.c.bf16 %v248_v28, %v248_v28 }
 0x12d   :  { %175 = vst.msk [vmem:[#allocation2 + $0x4] sm:$0xf] %vm173_vm2, %v1364_v17 }
 0x132   :  { %v257_v21 = vld [vmem:[#allocation2] sm:$0xf] }
 0x133   :  { %v264_v23 = vsel %vm259_vm3, %v257_v21, 0  ;;  %v1888_v29 = vld [vmem:[#allocation2] ss:$0 sps:$4 sm:$0xff]   ;;  %v1330_v43 = vcombine.low %v257_v21, %v257_v21 }
 0x134   :  { %1431 = vmatpush3.bf16.xpose.msra.mxu0 %v264_v23  ;;  %v258_v24 = vld [vmem:[#allocation2 + $0x4] sm:$0xf] }
 0x135   :  { %v310_v25 = vsel %vm259_vm3, %v258_v24, 0  ;;  %v1332_v26 = vcombine.low %v258_v24, %v258_v24  ;;  %1442 = vmatprep.subr.bf16.mxu0 %v1727_v0  ;;  %v1563_v56 = vld [vmem:[#allocation2 + $0x4] ss:$0 sps:$4 sm:$0xff]  }
 0x136   :  { %1437 = vmatpush3.bf16.xpose.msra.mxu1 %v310_v25 }
 0x137   :  { %431 = vrot.lane.b32.xlu1 %v1332_v26, %s1729_s5  ;;  %1448 = vmatprep.subr.bf16.mxu1 %v1727_v0 }
 0x13b   :  { %1433 = vmatmul.mubr.msk.bf16.vlgmr.msra.gmra.mrb[4].mxu0 %vm259_vm3, %v1885_v27  ;;  %491 = vrot.lane.b32.xlu1 %v1888_v29, %s1730_s3 }
 0x13c   :  { %1444 = vmatprep.mubr.msk.bf16.mxu0 %vm1728_vm0, %v1727_v0 }
 0x13d   :  { %1439 = vmatmul.mubr.msk.bf16.vlgmr.msra.gmra.mrb[4].mxu1 %vm259_vm3, %v1890_v30 }
 0x13e   :  { %1450 = vmatprep.mubr.msk.bf16.mxu1 %vm1728_vm0, %v1727_v0 }
 0x1a9   :  { %v432_v31 = vpop.permute.xlu1 %431 }
 0x1aa   :  { %v437_v32 = vsel %vm384_vm4, %v432_v31, 0  ;;  %v1933_v31 = vld [vmem:[#allocation2] ss:$0 sps:$4 sm:$0xff]  }
 0x1ab   :  { %1449 = vmatpush3.bf16.msra.mxu1 %v437_v32  ;;  %v1936_v32 = vld [vmem:[#allocation2 + $0x4] ss:$0 sps:$4 sm:$0xff]  }
 0x1ac   :  { %1460 = vmatprep.subr.bf16.mxu1 %v1727_v0 }
 0x1ad   :  { %v492_v57 = vpop.permute.xlu1 %491 }
 0x1ae   :  { %v497_v1 = vsel %vm259_vm3, %v492_v57, 0 }
 0x20e   :  { %v300_v33 = vpop.f32.mrb[4].mxu0 }
 0x20f   :  { %v1434_v34 = vpop.f32.mrb[5].mxu0  ;;  %v352_v35 = vsel %vm259_vm3, %v300_v33, -inf }
 0x210   :  { %v346_v36 = vpop.f32.mrb[4].mxu1  ;;  %353 = vmax.xlane.f32.xlu0 %v352_v35  ;;  %v303_v37 = vpop.f32.mrb[6].mxu0 }
 0x211   :  { %v1435_v38 = vpop.f32.mrb[7].mxu0  ;;  %v1440_v39 = vpop.f32.mrb[5].mxu1  ;;  %v355_v42 = vsel %vm259_vm3, %v346_v36, -inf }
 0x212   :  { %v349_v40 = vpop.f32.mrb[6].mxu1 }
 0x213   :  { %v1441_v41 = vpop.f32.mrb[7].mxu1 }
 0x214   :  { %356 = vmax.xlane.f32.xlu0 %v355_v42 }
 0x22a   :  { %379 = vrot.lane.b32.xlu0 %v1330_v43, %s1729_s5 }
 0x22e   :  { %486 = vrot.lane.b32.xlu0 %v1885_v27, %s1730_s3 }
 0x29d   :  { %v354_v44 = vpop.xlane.xlu0 %353 }
 0x29e   :  { %v358_v45 = vsub.f32 %v300_v33, %v354_v44 }
 0x2a0   :  { %v360_v46 = vmul.f32 1.442695, %v358_v45 }
 0x2a1   :  { %v357_v47 = vpop.xlane.xlu0 %356 }
 0x2a2   :  { %1571 = vpow2.f32 %v360_v46  ;;  %v359_v48 = vsub.f32 %v346_v36, %v357_v47 }
 0x2a4   :  { %v362_v49 = vmul.f32 1.442695, %v359_v48 }
 0x2a5   :  { %v380_v50 = vpop.permute.xlu0 %379 }
 0x2a6   :  { %1573 = vpow2.f32 %v362_v49  ;;  %v386_v51 = vsel %vm384_vm4, %v380_v50, 0 }
 0x2a7   :  { %1443 = vmatpush3.bf16.msra.mxu0 %v386_v51 }
 0x2a8   :  { %1454 = vmatprep.subr.bf16.mxu0 %v1727_v0 }
 0x2a9   :  { %v487_v6 = vpop.permute.xlu0 %486 }
 0x2ac   :  { %v1572_v52 = vpop.eup %1571 }
 0x2ad   :  { %v364_v53 = vsel %vm259_vm3, %v1572_v52, 0.0 }
 0x2ae   :  { %365 = vadd.xlane.f32.xlu1 %v364_v53 }
 0x2b0   :  { %v1574_v54 = vpop.eup %1573 }
 0x2b1   :  { %v367_v55 = vsel %vm259_vm3, %v1574_v54, 0.0 }
 0x2b2   :  { %368 = vadd.xlane.f32.xlu1 %v367_v55 }
 0x2c3   :  { %544 = vrot.lane.b32.xlu1 %v1563_v56, %s1730_s3 }
 0x2c7   :  { %539 = vrot.lane.b32.xlu1 %v1890_v30, %s1730_s3 }
 0x33b   :  { %v366_v58 = vpop.xlane.xlu1 %365 }
 0x33c   :  { %1575 = vrcp.f32 %v366_v58 }
 0x33f   :  { %v369_v59 = vpop.xlane.xlu1 %368 }
 0x340   :  { %1577 = vrcp.f32 %v369_v59 }
 0x343   :  { %v545_v3 = vpop.permute.xlu1 %544 }
 0x344   :  { %v550_v5 = vsel %vm259_vm3, %v545_v3, 0 }
 0x346   :  { %v1576_v60 = vpop.eup %1575 }
 0x347   :  { %v372_v61 = vmul.f32 %v1576_v60, %v1572_v52  ;;  %v540_v7 = vpop.permute.xlu1 %539 }
 0x349   :  { %v374_v62 = vpack.c.bf16 %v372_v61, %v372_v61 }
 0x34a   :  { %v1578_v63 = vpop.eup %1577 }
 0x34b   :  { %v373_v2 = vmul.f32 %v1578_v63, %v1574_v54  ;;  %1445 = vmatmul.mubr.msk.bf16.vlgmr.msra.gmra.mrb[8].mxu0 %vm259_vm3, %v374_v62 }
 0x34c   :  { %1455 = vmatpush3.bf16.xpose.msra.mxu0 %v497_v1  ;;  %1456 = vmatprep.mubr.msk.bf16.mxu0 %vm1728_vm0, %v1727_v0 }
 0x34d   :  { %v375_v4 = vpack.c.bf16 %v373_v2, %v373_v2  ;;  %1466 = vmatprep.subr.bf16.mxu0 %v1727_v0 }
 0x34f   :  { %1451 = vmatmul.mubr.msk.bf16.vlgmr.msra.gmra.mrb[8].mxu1 %vm259_vm3, %v375_v4 }
 0x350   :  { %1461 = vmatpush3.bf16.xpose.msra.mxu1 %v550_v5  ;;  %1462 = vmatprep.mubr.msk.bf16.mxu1 %vm1728_vm0, %v1727_v0 }
 0x351   :  { %1472 = vmatprep.subr.bf16.mxu1 %v1727_v0 }
 0x353   :  { %1457 = vmatmul.mubr.msk.bf16.vlgmr.msra.gmra.mrb[12].mxu0 %vm259_vm3, %v487_v6 }
 0x354   :  { %1468 = vmatprep.mubr.msk.bf16.mxu0 %vm1728_vm0, %v1727_v0 }
 0x357   :  { %1463 = vmatmul.mubr.msk.bf16.vlgmr.msra.gmra.mrb[12].mxu1 %vm259_vm3, %v540_v7 }
 0x358   :  { %1474 = vmatprep.mubr.msk.bf16.mxu1 %vm1728_vm0, %v1727_v0 }
 0x41e   :  { %v422_v8 = vpop.f32.mrb[8].mxu0 }
 0x41f   :  { %v479_v9 = vpack.c.bf16 %v422_v8, %v422_v8  ;;  %v1446_v10 = vpop.f32.mrb[9].mxu0 }
 0x420   :  { %v425_v11 = vpop.f32.mrb[10].mxu0 }
 0x421   :  { %482 = vst.msk [vmem:[#allocation3] sm:$0xf] %vm481_vm5, %v479_v9  ;;  %v1447_v12 = vpop.f32.mrb[11].mxu0 }
 0x422   :  { %v473_v13 = vpop.f32.mrb[8].mxu1 }
 0x423   :  { %v480_v14 = vpack.c.bf16 %v473_v13, %v473_v13  ;;  %v1452_v15 = vpop.f32.mrb[9].mxu1 }
 0x424   :  { %v476_v16 = vpop.f32.mrb[10].mxu1  ;;  %v1971_v15 = vld [vmem:[#allocation2] ss:$0 sps:$4 sm:$0xff]  }
 0x425   :  { %483 = vst.msk [vmem:[#allocation3 + $0x4] sm:$0xf] %vm481_vm5, %v480_v14  ;;  %v1453_v17 = vpop.f32.mrb[11].mxu1  ;;  %v1974_v16 = vld [vmem:[#allocation2 + $0x4] ss:$0 sps:$4 sm:$0xff]  }
 0x426   :  { %v533_v18 = vpop.f32.mrb[12].mxu0 }
 0x427   :  { %v1458_v19 = vpop.f32.mrb[13].mxu0  ;;  %v592_v20 = vsel %vm259_vm3, %v533_v18, -inf }
 0x428   :  { %593 = vmax.xlane.f32.xlu0 %v592_v20  ;;  %v536_v21 = vpop.f32.mrb[14].mxu0 }
 0x429   :  { %v1459_v22 = vpop.f32.mrb[15].mxu0 }
 0x42a   :  { %v586_v23 = vpop.f32.mrb[12].mxu1 }
 0x42b   :  { %v1464_v24 = vpop.f32.mrb[13].mxu1  ;;  %v595_v25 = vsel %vm259_vm3, %v586_v23, -inf }
 0x42c   :  { %596 = vmax.xlane.f32.xlu1 %v595_v25  ;;  %v589_v26 = vpop.f32.mrb[14].mxu1 }
 0x42d   :  { %v1465_v28 = vpop.f32.mrb[15].mxu1 }
 0x43d   :  { %664 = vrot.lane.b32.xlu1 %v1563_v56, %s1731_s11 }
 0x441   :  { %736 = vrot.lane.b32.xlu1 %v1933_v31, %s1732_s12 }
 0x445   :  { %789 = vrot.lane.b32.xlu1 %v1936_v32, %s1732_s12 }
 0x449   :  { %784 = vrot.lane.b32.xlu1 %v1890_v30, %s1732_s12 }
 0x4b5   :  { %v594_v33 = vpop.xlane.xlu0 %593 }
 0x4b6   :  { %v598_v34 = vsub.f32 %v533_v18, %v594_v33 }
 0x4b8   :  { %v600_v35 = vmul.f32 1.442695, %v598_v34 }
 0x4b9   :  { %v597_v36 = vpop.xlane.xlu1 %596 }
 0x4ba   :  { %1579 = vpow2.f32 %v600_v35  ;;  %v599_v37 = vsub.f32 %v586_v23, %v597_v36 }
 0x4bc   :  { %v602_v38 = vmul.f32 1.442695, %v599_v37 }
 0x4bd   :  { %v665_v39 = vpop.permute.xlu1 %664 }
 0x4be   :  { %1581 = vpow2.f32 %v602_v38  ;;  %v670_v40 = vsel %vm384_vm4, %v665_v39, 0 }
 0x4bf   :  { %1473 = vmatpush3.bf16.msra.mxu1 %v670_v40 }
 0x4c0   :  { %1484 = vmatprep.subr.bf16.mxu1 %v1727_v0 }
 0x4c1   :  { %v737_v50 = vpop.permute.xlu1 %736 }
 0x4c2   :  { %v742_v55 = vsel %vm259_vm3, %v737_v50, 0 }
 0x4c4   :  { %v1580_v41 = vpop.eup %1579 }
 0x4c5   :  { %v604_v42 = vsel %vm259_vm3, %v1580_v41, 0.0 }
 0x4c6   :  { %605 = vadd.xlane.f32.xlu0 %v604_v42 }
 0x4c8   :  { %v1582_v43 = vpop.eup %1581 }
 0x4c9   :  { %v607_v44 = vsel %vm259_vm3, %v1582_v43, 0.0 }
 0x4ca   :  { %608 = vadd.xlane.f32.xlu0 %v607_v44 }
 0x4e0   :  { %616 = vrot.lane.b32.xlu0 %v1888_v29, %s1731_s11  ;;  %v790_v29 = vpop.permute.xlu1 %789 }
 0x4e1   :  { %v795_v57 = vsel %vm259_vm3, %v790_v29, 0 }
 0x4e4   :  { %731 = vrot.lane.b32.xlu0 %v1885_v27, %s1732_s12  ;;  %v785_v59 = vpop.permute.xlu1 %784 }
 0x553   :  { %v606_v45 = vpop.xlane.xlu0 %605 }
 0x554   :  { %1583 = vrcp.f32 %v606_v45 }
 0x557   :  { %v609_v46 = vpop.xlane.xlu0 %608 }
 0x558   :  { %1585 = vrcp.f32 %v609_v46 }
 0x55b   :  { %v617_v47 = vpop.permute.xlu0 %616 }
 0x55c   :  { %v622_v48 = vsel %vm384_vm4, %v617_v47, 0 }
 0x55d   :  { %1467 = vmatpush3.bf16.msra.mxu0 %v622_v48 }
 0x55e   :  { %v1584_v49 = vpop.eup %1583  ;;  %1478 = vmatprep.subr.bf16.mxu0 %v1727_v0 }
 0x55f   :  { %v612_v51 = vmul.f32 %v1584_v49, %v1580_v41  ;;  %v732_v58 = vpop.permute.xlu0 %731 }
 0x561   :  { %v614_v52 = vpack.c.bf16 %v612_v51, %v612_v51 }
 0x562   :  { %v1586_v53 = vpop.eup %1585 }
 0x563   :  { %v613_v54 = vmul.f32 %v1586_v53, %v1582_v43  ;;  %1469 = vmatmul.mubr.msk.bf16.vlgmr.msra.gmra.mrb[16].mxu0 %vm259_vm3, %v614_v52 }
 0x564   :  { %1480 = vmatprep.mubr.msk.bf16.mxu0 %vm1728_vm0, %v1727_v0 }
 0x565   :  { %v615_v56 = vpack.c.bf16 %v613_v54, %v613_v54 }
 0x566   :  { %1479 = vmatpush3.bf16.xpose.msra.mxu0 %v742_v55 }
 0x567   :  { %1475 = vmatmul.mubr.msk.bf16.vlgmr.msra.gmra.mrb[16].mxu1 %vm259_vm3, %v615_v56  ;;  %1490 = vmatprep.subr.bf16.mxu0 %v1727_v0 }
 0x568   :  { %1485 = vmatpush3.bf16.xpose.msra.mxu1 %v795_v57  ;;  %1486 = vmatprep.mubr.msk.bf16.mxu1 %vm1728_vm0, %v1727_v0 }
 0x569   :  { %1496 = vmatprep.subr.bf16.mxu1 %v1727_v0 }
 0x56d   :  { %1481 = vmatmul.mubr.msk.bf16.vlgmr.msra.gmra.mrb[20].mxu0 %vm259_vm3, %v732_v58 }
 0x56e   :  { %1492 = vmatprep.mubr.msk.bf16.mxu0 %vm1728_vm0, %v1727_v0 }
 0x56f   :  { %1487 = vmatmul.mubr.msk.bf16.vlgmr.msra.gmra.mrb[20].mxu1 %vm259_vm3, %v785_v59 }
 0x570   :  { %1498 = vmatprep.mubr.msk.bf16.mxu1 %vm1728_vm0, %v1727_v0 }
 0x636   :  { %v1964_v60 = vpop.f32.mrb[16].mxu0 }
 0x637   :  { %v1470_v61 = vpop.f32.mrb[17].mxu0 }
 0x638   :  { %v661_v62 = vpop.f32.mrb[18].mxu0 }
 0x639   :  { %v1471_v63 = vpop.f32.mrb[19].mxu0 }
 0x63a   :  { %v1966_v1 = vpop.f32.mrb[16].mxu1 }
 0x63b   :  { %v1476_v2 = vpop.f32.mrb[17].mxu1 }
 0x63c   :  { %v709_v3 = vpop.f32.mrb[18].mxu1  ;;  %v1367_v2 = vpack.c.bf16 %v1964_v60, %v1964_v60 }
 0x63d   :  { %v1477_v4 = vpop.f32.mrb[19].mxu1  ;;  %v1368_v3 = vpack.c.bf16 %v1966_v1, %v1966_v1 }
 0x640   :  { %v778_v5 = vpop.f32.mrb[20].mxu0 }
 0x641   :  { %v1482_v6 = vpop.f32.mrb[21].mxu0  ;;  %v837_v7 = vsel %vm259_vm3, %v778_v5, -inf }
 0x642   :  { %v831_v8 = vpop.f32.mrb[20].mxu1  ;;  %838 = vmax.xlane.f32.xlu0 %v837_v7  ;;  %v781_v9 = vpop.f32.mrb[22].mxu0 }
 0x643   :  { %v1483_v10 = vpop.f32.mrb[23].mxu0  ;;  %v1488_v11 = vpop.f32.mrb[21].mxu1  ;;  %v840_v12 = vsel %vm259_vm3, %v831_v8, -inf }
 0x644   :  { %841 = vmax.xlane.f32.xlu1 %v840_v12  ;;  %v834_v13 = vpop.f32.mrb[22].mxu1 }
 0x645   :  { %v1489_v14 = vpop.f32.mrb[23].mxu1 }
 0x655   :  { %909 = vrot.lane.b32.xlu1 %v1936_v32, %s1733_s13 }
 0x659   :  { %981 = vrot.lane.b32.xlu1 %v1971_v15, %s1734_s14 }
 0x65d   :  { %1034 = vrot.lane.b32.xlu1 %v1974_v16, %s1734_s14 }
 0x661   :  { %1029 = vrot.lane.b32.xlu1 %v1890_v30, %s1734_s14 }
 0x6cf   :  { %v839_v17 = vpop.xlane.xlu0 %838 }
 0x6d0   :  { %v843_v18 = vsub.f32 %v778_v5, %v839_v17 }
 0x6d1   :  { %v842_v19 = vpop.xlane.xlu1 %841 }
 0x6d2   :  { %v845_v20 = vmul.f32 1.442695, %v843_v18  ;;  %v844_v21 = vsub.f32 %v831_v8, %v842_v19 }
 0x6d4   :  { %1587 = vpow2.f32 %v845_v20  ;;  %v847_v22 = vmul.f32 1.442695, %v844_v21 }
 0x6d5   :  { %v910_v23 = vpop.permute.xlu1 %909 }
 0x6d6   :  { %1589 = vpow2.f32 %v847_v22  ;;  %v915_v24 = vsel %vm384_vm4, %v910_v23, 0 }
 0x6d7   :  { %1497 = vmatpush3.bf16.msra.mxu1 %v915_v24 }
 0x6d8   :  { %1508 = vmatprep.subr.bf16.mxu1 %v1727_v0 }
 0x6d9   :  { %v982_v37 = vpop.permute.xlu1 %981 }
 0x6de   :  { %v1588_v25 = vpop.eup %1587 }
 0x6df   :  { %v849_v26 = vsel %vm259_vm3, %v1588_v25, 0.0 }
 0x6e0   :  { %v1590_v28 = vpop.eup %1589  ;;  %850 = vadd.xlane.f32.xlu0 %v849_v26 }
 0x6e1   :  { %v852_v30 = vsel %vm259_vm3, %v1590_v28, 0.0 }
 0x6e4   :  { %853 = vadd.xlane.f32.xlu0 %v852_v30 }
 0x6fa   :  { %861 = vrot.lane.b32.xlu0 %v1933_v31, %s1733_s13  ;;  %v1035_v31 = vpop.permute.xlu1 %1034 }
 0x6fb   :  { %v1040_v43 = vsel %vm259_vm3, %v1035_v31, 0 }
 0x6fe   :  { %976 = vrot.lane.b32.xlu0 %v1885_v27, %s1734_s14  ;;  %v987_v27 = vsel %vm259_vm3, %v982_v37, 0  ;;  %v1030_v45 = vpop.permute.xlu1 %1029 }
 0x76d   :  { %v851_v32 = vpop.xlane.xlu0 %850 }
 0x76e   :  { %1591 = vrcp.f32 %v851_v32 }
 0x771   :  { %v854_v33 = vpop.xlane.xlu0 %853 }
 0x772   :  { %1593 = vrcp.f32 %v854_v33  ;;  %v1568_v33 = vld [vmem:[%s2057_s6] sm:$0xff]  }
 0x775   :  { %v862_v34 = vpop.permute.xlu0 %861 }
 0x776   :  { %v867_v35 = vsel %vm384_vm4, %v862_v34, 0  ;;  %v1569_v34 = vld [vmem:[%s2057_s6 + $0x8] sm:$0xff]  }
 0x777   :  { %1491 = vmatpush3.bf16.msra.mxu0 %v867_v35 }
 0x778   :  { %v1592_v36 = vpop.eup %1591  ;;  %1502 = vmatprep.subr.bf16.mxu0 %v1727_v0 }
 0x779   :  { %v857_v38 = vmul.f32 %v1592_v36, %v1588_v25  ;;  %v977_v44 = vpop.permute.xlu0 %976 }
 0x77b   :  { %v859_v39 = vpack.c.bf16 %v857_v38, %v857_v38 }
 0x77c   :  { %v1594_v40 = vpop.eup %1593 }
 0x77d   :  { %v858_v41 = vmul.f32 %v1594_v40, %v1590_v28  ;;  %1493 = vmatmul.mubr.msk.bf16.vlgmr.msra.gmra.mrb[24].mxu0 %vm259_vm3, %v859_v39 }
 0x77e   :  { %1504 = vmatprep.mubr.msk.bf16.mxu0 %vm1728_vm0, %v1727_v0 }
 0x77f   :  { %v860_v42 = vpack.c.bf16 %v858_v41, %v858_v41 }
 0x780   :  { %1503 = vmatpush3.bf16.xpose.msra.mxu0 %v987_v27 }
 0x781   :  { %1499 = vmatmul.mubr.msk.bf16.vlgmr.msra.gmra.mrb[24].mxu1 %vm259_vm3, %v860_v42  ;;  %1514 = vmatprep.subr.bf16.mxu0 %v1727_v0 }
 0x782   :  { %1509 = vmatpush3.bf16.xpose.msra.mxu1 %v1040_v43  ;;  %1510 = vmatprep.mubr.msk.bf16.mxu1 %vm1728_vm0, %v1727_v0 }
 0x783   :  { %1520 = vmatprep.subr.bf16.mxu1 %v1727_v0 }
 0x787   :  { %1505 = vmatmul.mubr.msk.bf16.vlgmr.msra.gmra.mrb[28].mxu0 %vm259_vm3, %v977_v44 }
 0x788   :  { %1516 = vmatprep.mubr.msk.bf16.mxu0 %vm1728_vm0, %v1727_v0 }
 0x789   :  { %1511 = vmatmul.mubr.msk.bf16.vlgmr.msra.gmra.mrb[28].mxu1 %vm259_vm3, %v1030_v45  ;;  %v1358_v45 = vld [vmem:[%s2058_s7] ss:$0 sm:$0xff] }
 0x78a   :  { %1522 = vmatprep.mubr.msk.bf16.mxu1 %vm1728_vm0, %v1727_v0 }
 0x850   :  { %v903_v46 = vpop.f32.mrb[24].mxu0 }
 0x851   :  { %v1494_v47 = vpop.f32.mrb[25].mxu0  ;;  %v1369_v19 = vpack.c.bf16 %v903_v46, %v903_v46 }
 0x852   :  { %v906_v48 = vpop.f32.mrb[26].mxu0 }
 0x853   :  { %v1495_v49 = vpop.f32.mrb[27].mxu0 }
 0x854   :  { %v951_v50 = vpop.f32.mrb[24].mxu1 }
 0x855   :  { %v1500_v51 = vpop.f32.mrb[25].mxu1  ;;  %v1370_v4 = vpack.c.bf16 %v951_v50, %v951_v50 }
 0x856   :  { %v954_v52 = vpop.f32.mrb[26].mxu1 }
 0x857   :  { %v1501_v53 = vpop.f32.mrb[27].mxu1 }
 0x85a   :  { %v1023_v54 = vpop.f32.mrb[28].mxu0 }
 0x85b   :  { %v1506_v29 = vpop.f32.mrb[29].mxu0  ;;  %v1082_v55 = vsel %vm259_vm3, %v1023_v54, -inf }
 0x85c   :  { %v1076_v56 = vpop.f32.mrb[28].mxu1  ;;  %1083 = vmax.xlane.f32.xlu0 %v1082_v55  ;;  %v1026_v57 = vpop.f32.mrb[30].mxu0 }
 0x85d   :  { %v1507_v58 = vpop.f32.mrb[31].mxu0  ;;  %v1512_v59 = vpop.f32.mrb[29].mxu1  ;;  %v1085_v61 = vsel %vm259_vm3, %v1076_v56, -inf }
 0x85e   :  { %1086 = vmax.xlane.f32.xlu1 %v1085_v61  ;;  %v1079_v62 = vpop.f32.mrb[30].mxu1 }
 0x85f   :  { %v1513_v63 = vpop.f32.mrb[31].mxu1 }
 0x86f   :  { %1154 = vrot.lane.b32.xlu1 %v1974_v16, %s1735_s15 }
 0x873   :  { %720 = vrot.lane.b32.xlu1 %v1367_v2, %s1736_s16 }
 0x877   :  { %722 = vrot.lane.b32.xlu1 %v1368_v3, %s1736_s16 }
 0x87b   :  { %967 = vrot.lane.b32.xlu1 %v1370_v4, %s1737_s19 }
 0x8e9   :  { %v1084_v5 = vpop.xlane.xlu0 %1083 }
 0x8ea   :  { %v1088_v6 = vsub.f32 %v1023_v54, %v1084_v5 }
 0x8eb   :  { %v1087_v7 = vpop.xlane.xlu1 %1086 }
 0x8ec   :  { %v1090_v8 = vmul.f32 1.442695, %v1088_v6  ;;  %v1089_v9 = vsub.f32 %v1076_v56, %v1087_v7 }
 0x8ee   :  { %1595 = vpow2.f32 %v1090_v8  ;;  %v1092_v10 = vmul.f32 1.442695, %v1089_v9 }
 0x8ef   :  { %v1155_v11 = vpop.permute.xlu1 %1154 }
 0x8f0   :  { %1597 = vpow2.f32 %v1092_v10  ;;  %v1160_v60 = vsel %vm384_vm4, %v1155_v11, 0 }
 0x8f1   :  { %1521 = vmatpush3.bf16.msra.mxu1 %v1160_v60 }
 0x8f3   :  { %v721_v12 = vpop.permute.xlu1 %720 }
 0x8f4   :  { %727 = vst.msk [vmem:[#allocation3] sm:$0xf] %vm726_vm6, %v721_v12 }
 0x8f7   :  { %v723_v1 = vpop.permute.xlu1 %722 }
 0x8f8   :  { %v1596_v13 = vpop.eup %1595  ;;  %728 = vst.msk [vmem:[#allocation3 + $0x4] sm:$0xf] %vm726_vm6, %v723_v1 }
 0x8f9   :  { %v1094_v14 = vsel %vm259_vm3, %v1596_v13, 0.0 }
 0x8fa   :  { %v1598_v16 = vpop.eup %1597  ;;  %1095 = vadd.xlane.f32.xlu0 %v1094_v14 }
 0x8fb   :  { %v968_v17 = vpop.permute.xlu1 %967  ;;  %v1097_v18 = vsel %vm259_vm3, %v1598_v16, 0.0 }
 0x8fc   :  { %973 = vst.msk [vmem:[#allocation3 + $0x4] sm:$0xf] %vm971_vm7, %v968_v17 }
 0x8fe   :  { %1098 = vadd.xlane.f32.xlu0 %v1097_v18 }
 0x914   :  { %1106 = vrot.lane.b32.xlu0 %v1971_v15, %s1735_s15 }
 0x918   :  { %965 = vrot.lane.b32.xlu0 %v1369_v19, %s1737_s19 }
 0x987   :  { %v1096_v20 = vpop.xlane.xlu0 %1095 }
 0x988   :  { %1599 = vrcp.f32 %v1096_v20 }
 0x98b   :  { %v1099_v21 = vpop.xlane.xlu0 %1098 }
 0x98c   :  { %1601 = vrcp.f32 %v1099_v21 }
 0x98f   :  { %v1107_v22 = vpop.permute.xlu0 %1106 }
 0x990   :  { %v1112_v23 = vsel %vm384_vm4, %v1107_v22, 0 }
 0x991   :  { %1515 = vmatpush3.bf16.msra.mxu0 %v1112_v23 }
 0x992   :  { %v1600_v24 = vpop.eup %1599  ;;  %1526 = vmatprep.subr.bf16.mxu0 %v1727_v0 }
 0x993   :  { %v1102_v25 = vmul.f32 %v1600_v24, %v1596_v13  ;;  %v966_v26 = vpop.permute.xlu0 %965 }
 0x994   :  { %972 = vst.msk [vmem:[#allocation3] sm:$0xf] %vm971_vm7, %v966_v26 }
 0x995   :  { %v1104_v28 = vpack.c.bf16 %v1102_v25, %v1102_v25 }
 0x996   :  { %v1602_v30 = vpop.eup %1601 }
 0x997   :  { %v1103_v15 = vmul.f32 %v1602_v30, %v1598_v16  ;;  %1517 = vmatmul.mubr.msk.bf16.vlgmr.msra.gmra.mrb[32].mxu0 %vm259_vm3, %v1104_v28 }
 0x998   :  { %1530 = vmatprep.mubr.msk.bf16.mxu0 %vm1728_vm0, %v1727_v0  ;;  %1527 = vmatpush3.bf16.msra.mxu0 %v1568_v33 }
 0x999   :  { %v1105_v32 = vpack.c.bf16 %v1103_v15, %v1103_v15  ;;  %1528 = vmatprep.subr.bf16.mxu0 %v1727_v0 }
 0x99b   :  { %1523 = vmatmul.mubr.msk.bf16.vlgmr.msra.gmra.mrb[32].mxu1 %vm259_vm3, %v1105_v32 }
 0x99c   :  { %1529 = vmatpush3.bf16.msra.mxu0 %v1569_v34 }
 0xa6a   :  { %v1148_v35 = vpop.f32.mrb[32].mxu0 }
 0xa6b   :  { %v1371_v36 = vpack.c.bf16 %v1148_v35, %v1148_v35  ;;  %v1518_v37 = vpop.f32.mrb[33].mxu0 }
 0xa6c   :  { %v1151_v38 = vpop.f32.mrb[34].mxu0 }
 0xa6d   :  { %1210 = vrot.lane.b32.xlu0 %v1371_v36, %s1738_s22  ;;  %v1519_v39 = vpop.f32.mrb[35].mxu0 }
 0xa6e   :  { %v1196_v40 = vpop.f32.mrb[32].mxu1 }
 0xa6f   :  { %v1372_v41 = vpack.c.bf16 %v1196_v40, %v1196_v40  ;;  %v1524_v31 = vpop.f32.mrb[33].mxu1 }
 0xa70   :  { %v1199_v27 = vpop.f32.mrb[34].mxu1 }
 0xa71   :  { %1212 = vrot.lane.b32.xlu1 %v1372_v41, %s1738_s22  ;;  %v1525_v42 = vpop.f32.mrb[35].mxu1 }
 0xadf   :  { %v1211_v43 = vpop.permute.xlu0 %1210 }
 0xae0   :  { %1217 = vst.msk [vmem:[#allocation3] sm:$0xf] %vm1216_vm8, %v1211_v43 }
 0xae3   :  { %v1213_v44 = vpop.permute.xlu1 %1212 }
 0xae4   :  { %1218 = vst.msk [vmem:[#allocation3 + $0x4] sm:$0xf] %vm1216_vm8, %v1213_v44 }
 0xaeb   :  { %v1570_v0 = vld [vmem:[#allocation3] sm:$0xff]  }
 0xaec   :  { %1531 = vmatmul.mubr.msk.bf16.vlgmr.msra.gmra.mrb[36].mxu0 %vm120_vm1, %v1570_v0 }
 0xbbf   :  { %v1286_v46 = vpop.f32.mrb[36].mxu0 }
 0xbc0   :  { %v1287_v47 = vadd.f32 %v1358_v45, %v1286_v46  ;;  %v1532_v48 = vpop.f32.mrb[37].mxu0 }
 0xbc1   :  { %v1289_v49 = vpop.f32.mrb[38].mxu0 }
 0xbc2   :  { %1293 = vst.msk [vmem:[#allocation12] sm:$0xff] %vm120_vm1, %v1287_v47  ;;  %v1290_v50 = vadd.f32 %v1358_v45, %v1289_v49  ;;  %v1533_v51 = vpop.f32.mrb[39].mxu0 }
 0xbc4   :  { %1294 = vst.msk [vmem:[#allocation12 + $0x8] sm:$0xff] %vm120_vm1, %v1290_v50 }
 0xbc5   :  { %1702 = shalt.err (!%p1699_p8)
}
 0xbc6   :  { %s1703_s29 = scalar_lea.hbm %s2059_s8, 256 }
 0xbc7   :  { %p1704_p9 = scmp.ne.s32.totalorder %s2059_s8, %s1703_s29  ;;  %p1707_p10 = scmp.lt.u32.totalorder %s1703_s29, %s2059_s8 }
 0xbc9   :  { %p1709_p11 = pnand %p1707_p10, %p1704_p9 }
 0xbcb   :  { %1712 = shalt.err (!%p1709_p11)
}
 0xbcc   :  { %s1740_s4 = smov 128  }
 0xbcd   :  { %1306 = dma.vmem_to_hbm [thread:$0]  %s1301_s25, 256, %s2059_s8, [#allocation6], %s1740_s4, %s1740_s4, %s1736_s16  }
 0xbce   :  { %1719 = dma.done.wait [#allocation6], 256  }
 0xbcf   :  { %1720 = vsyncadd [#allocation6], 4294967040 }
 0xbd0   :  { %1310 = vsyncpa [#allocation5], 1 }
 0xbd1   :  { %1311 = vsyncpa [#allocation8], 1 }
 0xbd2   :  { %1312 = vsyncpa [#allocation11], 1 }
 0xbd3   :  { %1313 = vsyncpa [#allocation6], 1 }

// kernel: tpu_custom_call.1
= control target key start
LH: loop header
LB: loop body
LE: loop exit
PB: predicated region body
PF: predicated region fallthrough
CT: control target
= control target key end

     0   :  { %13 = vsyncpa [#allocation5], 0  ;;  %s2051_s0 = inlined_call_operand.hbm [shape: bf16[2,8,32], index: 0, kind: input, shape index: {}]   ;;  %s2052_s1 = inlined_call_operand.hbm [shape: bf16[2,8,32], index: 1, kind: input, shape index: {}]   ;;  %s2053_s2 = inlined_call_operand.hbm [shape: bf16[32,32], index: 2, kind: input, shape index: {}]   ;;  %s2054_s3 = inlined_call_operand.vmem [shape: f32[1,32], index: 3, kind: input, shape index: {}]   ;;  %s2055_s4 = inlined_call_operand.hbm [shape: bf16[32,64], index: 4, kind: input, shape index: {}]   ;;  %s2056_s5 = inlined_call_operand.vmem [shape: f32[1,64], index: 5, kind: input, shape index: {}]   ;;  %s2057_s6 = inlined_call_operand.vmem [shape: bf16[32,32], index: 6, kind: input, shape index: {}]   ;;  %s2058_s7 = inlined_call_operand.vmem [shape: f32[1,32], index: 7, kind: input, shape index: {}]   ;;  %s2059_s8 = inlined_call_operand.hbm [shape: f32[2,8,32], index: 8, kind: output, shape index: {}]  }
   0x1   :  { %14 = vsyncpa [#allocation8], 0 }
   0x2   :  { %15 = vsyncpa [#allocation11], 0 }
   0x3   :  { %16 = vsyncpa [#allocation6], 0  ;;  %s1721_s27 = smov [#allocation7]   ;;  %s1722_s29 = smov [#allocation4]  }
   0x4   :  { %s34_s28 = sshll.u32 %s1721_s27, 4  ;;  %s22_s30 = sshll.u32 %s1722_s29, 4  ;;  %s35_s28 = int_to_ptr.vmem [resolvable:$true] %s34_s28  ;;  %s1786_s30 = int_to_ptr.vmem [resolvable:$true] %s22_s30 }
   0x5   :  { %s1603_s11 = scalar_lea.hbm %s2052_s1, 128 }
   0x6   :  { %p1604_p0 = scmp.ne.s32.totalorder %s2052_s1, %s1603_s11  ;;  %p1607_p1 = scmp.lt.u32.totalorder %s1603_s11, %s2052_s1 }
   0x8   :  { %p1609_p2 = pnand %p1607_p1, %p1604_p0 }
   0xa   :  { %1612 = shalt.err (!%p1609_p2)
}
   0xb   :  { %s1613_s16 = scalar_lea.vmem %s35_s28, 128  ;;  %p1618_p4 = scmp.lt.s32.totalorder %s35_s28, %s35_s28 }
   0xc   :  { %p1614_p3 = scmp.ne.s32.totalorder %s35_s28, %s1613_s16  ;;  %p1619_p5 = scmp.lt.s32.totalorder %s1613_s16, %s1613_s16 }
   0xe   :  { %p1620_p6 = por %p1619_p5, %p1618_p4 }
  0x10   :  { %p1621_p7 = pnand %p1620_p6, %p1614_p3 }
  0x12   :  { %1624 = shalt.err (!%p1621_p7)
}
  0x13   :  { %s1723_s17 = smov 64   ;;  %s1724_s18 = smov 4  }
  0x14   :  { %40 = dma.hbm_to_vmem [thread:$0]  %s2052_s1, 128, %s35_s28, [#allocation8], %s1723_s17, %s1723_s17, %s1724_s18  }
  0x15   :  { %s1625_s23 = scalar_lea.hbm %s2051_s0, 128 }
  0x16   :  { %p1626_p8 = scmp.ne.s32.totalorder %s2051_s0, %s1625_s23  ;;  %p1629_p9 = scmp.lt.u32.totalorder %s1625_s23, %s2051_s0 }
  0x18   :  { %p1631_p10 = pnand %p1629_p9, %p1626_p8 }
  0x1a   :  { %1634 = shalt.err (!%p1631_p10)
}
  0x1b   :  { %s1635_s29 = scalar_lea.vmem %s1786_s30, 128  ;;  %p1640_p12 = scmp.lt.s32.totalorder %s1786_s30, %s1786_s30 }
  0x1c   :  { %p1636_p11 = scmp.ne.s32.totalorder %s1786_s30, %s1635_s29  ;;  %p1641_p13 = scmp.lt.s32.totalorder %s1635_s29, %s1635_s29 }
  0x1e   :  { %p1642_p0 = por %p1641_p13, %p1640_p12 }
  0x20   :  { %p1643_p1 = pnand %p1642_p0, %p1636_p11 }
  0x22   :  { %1646 = shalt.err (!%p1643_p1)
}
  0x23   :  { %28 = dma.hbm_to_vmem [thread:$0]  %s2051_s0, 128, %s1786_s30, [#allocation5], %s1723_s17, %s1723_s17, %s1724_s18  }
  0x24   :  { %s1725_s9 = smov [#allocation9]   ;;  %s1726_s11 = smov [#allocation10]  }
  0x25   :  { %s46_s10 = sshll.u32 %s1725_s9, 4  ;;  %s60_s12 = sshll.u32 %s1726_s11, 4  ;;  %s47_s10 = int_to_ptr.vmem [resolvable:$true] %s46_s10  ;;  %s1823_s12 = int_to_ptr.vmem [resolvable:$true] %s60_s12 }
  0x26   :  { %s1647_s15 = scalar_lea.hbm %s2053_s2, 256 }
  0x27   :  { %p1648_p2 = scmp.ne.s32.totalorder %s2053_s2, %s1647_s15  ;;  %p1651_p3 = scmp.lt.u32.totalorder %s1647_s15, %s2053_s2 }
  0x29   :  { %p1653_p4 = pnand %p1651_p3, %p1648_p2 }
  0x2b   :  { %1656 = shalt.err (!%p1653_p4)
}
  0x2c   :  { %s1657_s0 = scalar_lea.vmem %s47_s10, 256  ;;  %p1662_p6 = scmp.lt.s32.totalorder %s47_s10, %s47_s10 }
  0x2d   :  { %p1658_p5 = scmp.ne.s32.totalorder %s47_s10, %s1657_s0  ;;  %p1663_p7 = scmp.lt.s32.totalorder %s1657_s0, %s1657_s0 }
  0x2f   :  { %p1664_p8 = por %p1663_p7, %p1662_p6 }
  0x31   :  { %p1665_p9 = pnand %p1664_p8, %p1658_p5 }
  0x33   :  { %1668 = shalt.err (!%p1665_p9)
}
  0x34   :  { %52 = dma.hbm_to_vmem [thread:$0]  %s2053_s2, 256, %s47_s10, [#allocation8], %s1723_s17, %s1723_s17, %s1724_s18  }
  0x35   :  { %s1669_s25 = scalar_lea.hbm %s2055_s4, 256 }
  0x36   :  { %p1670_p10 = scmp.ne.s32.totalorder %s2055_s4, %s1669_s25  ;;  %p1673_p11 = scmp.lt.u32.totalorder %s1669_s25, %s2055_s4 }
  0x38   :  { %p1675_p12 = pnand %p1673_p11, %p1670_p10 }
  0x3a   :  { %1678 = shalt.err (!%p1675_p12)
}
  0x3b   :  { %s1679_s28 = scalar_lea.vmem %s1823_s12, 256  ;;  %p1684_p0 = scmp.lt.s32.totalorder %s1823_s12, %s1823_s12 }
  0x3c   :  { %p1680_p13 = scmp.ne.s32.totalorder %s1823_s12, %s1679_s28  ;;  %p1685_p1 = scmp.lt.s32.totalorder %s1679_s28, %s1679_s28 }
  0x3e   :  { %p1686_p2 = por %p1685_p1, %p1684_p0 }
  0x40   :  { %p1687_p3 = pnand %p1686_p2, %p1680_p13 }
  0x42   :  { %1690 = shalt.err (!%p1687_p3)
}
  0x43   :  { %66 = dma.hbm_to_vmem [thread:$0]  %s2055_s4, 256, %s1823_s12, [#allocation11], %s1723_s17, %s1723_s17, %s1724_s18  }
  0x44   :  { %1713 = dma.done.wait [#allocation5], 128  }
  0x45   :  { %1714 = vsyncadd [#allocation5], 4294967168 }
  0x46   :  { %1715 = dma.done.wait [#allocation8], 384  }
  0x47   :  { %1716 = vsyncadd [#allocation8], 4294966912 }
  0x48   :  { %1717 = dma.done.wait [#allocation11], 256  }
  0x49   :  { %1718 = vsyncadd [#allocation11], 4294967040  ;;  %v1727_v0 = vmov 0.0   ;;  %vm1728_vm0 = vmmov 0   ;;  %v1554_v1 = vld [vmem:[#allocation10] sm:$0xff]   ;;  %v1555_v2 = vld [vmem:[#allocation10 + $0x8] sm:$0xff]  }
  0x4a   :  { %1414 = vmatprep.subr.bf16.mxu0 %v1727_v0  ;;  %1418 = vmatprep.mubr.msk.bf16.mxu0 %vm1728_vm0, %v1727_v0  ;;  %v1557_v3 = vld [vmem:[#allocation9] sm:$0xff]   ;;  %v1556_v4 = vld [vmem:[#allocation7] sm:$0xff]   ;;  %v1558_v5 = vld [vmem:[#allocation9 + $0x8] sm:$0xff]   ;;  %vm120_vm1 = vcmask 261120   ;;  %vm173_vm2 = vcmask 519168   ;;  %vm259_vm3 = vcmask 64512  }
  0x4b   :  { %1422 = vmatprep.subr.bf16.mxu1 %v1727_v0  ;;  %1426 = vmatprep.mubr.msk.bf16.mxu1 %vm1728_vm0, %v1727_v0  ;;  %v1559_v6 = vld [vmem:[#allocation4] sm:$0xff]   ;;  %vm384_vm4 = vcmask 1043456   ;;  %vm481_vm5 = vcmask 60416   ;;  %s1731_s11 = smov 88   ;;  %s1732_s12 = smov 112   ;;  %vm726_vm6 = vcmask 126016  }
  0x4c   :  { %1415 = vmatpush3.bf16.msra.mxu0 %v1554_v1  ;;  %1423 = vmatpush3.bf16.msra.mxu1 %v1557_v3  ;;  %v1314_v7 = vld [vmem:[%s2056_s5] ss:$0 sm:$0xff]  ;;  %s1729_s5 = smov 96   ;;  %s1733_s13 = smov 80   ;;  %vm971_vm7 = vcmask 191616   ;;  %vm1216_vm8 = vcmask 257216  }
  0x4d   :  { %1416 = vmatprep.subr.bf16.mxu0 %v1727_v0  ;;  %1424 = vmatprep.subr.bf16.mxu1 %v1727_v0  ;;  %v1321_v20 = vld [vmem:[%s2054_s3] ss:$0 sm:$0xff]  ;;  %s1730_s3 = smov 120   ;;  %s1734_s14 = smov 104  }
  0x4e   :  { %s1735_s15 = smov 72   ;;  %s1736_s16 = smov 8  }
  0x4f   :  { %s1737_s19 = smov 16   ;;  %s1738_s22 = smov 24  }
  0x50   :  { %1417 = vmatpush3.bf16.msra.mxu0 %v1555_v2  ;;  %1425 = vmatpush3.bf16.msra.mxu1 %v1558_v5  ;;  %s1739_s24 = smov [#allocation12]  }
  0x51   :  { %1430 = vmatprep.subr.bf16.mxu0 %v1727_v0  ;;  %1436 = vmatprep.subr.bf16.mxu1 %v1727_v0  ;;  %s1300_s25 = sshll.u32 %s1739_s24, 4  ;;  %s1301_s25 = int_to_ptr.vmem [resolvable:$true] %s1300_s25 }
  0x52   :  { %s1691_s26 = scalar_lea.vmem %s1301_s25, 256  ;;  %p1696_p5 = scmp.lt.s32.totalorder %s1301_s25, %s1301_s25 }
  0x53   :  { %1419 = vmatmul.mubr.msk.bf16.vlgmr.msra.gmra.mrb[0].mxu0 %vm120_vm1, %v1556_v4  ;;  %1427 = vmatmul.mubr.msk.bf16.vlgmr.msra.gmra.mrb[0].mxu1 %vm120_vm1, %v1559_v6  ;;  %p1692_p4 = scmp.ne.s32.totalorder %s1301_s25, %s1691_s26  ;;  %p1697_p6 = scmp.lt.s32.totalorder %s1691_s26, %s1691_s26 }
  0x54   :  { %1432 = vmatprep.mubr.msk.bf16.mxu0 %vm1728_vm0, %v1727_v0  ;;  %1438 = vmatprep.mubr.msk.bf16.mxu1 %vm1728_vm0, %v1727_v0 }
  0x55   :  { %p1698_p7 = por %p1697_p6, %p1696_p5 }
  0x57   :  { %p1699_p8 = pnand %p1698_p7, %p1692_p4 }
 0x126   :  { %v158_v8 = vpop.f32.mrb[0].mxu0  ;;  %v244_v15 = vpop.f32.mrb[0].mxu1 }
 0x127   :  { %v159_v9 = vadd.f32 %v1314_v7, %v158_v8  ;;  %v1420_v10 = vpop.f32.mrb[1].mxu0  ;;  %v1428_v16 = vpop.f32.mrb[1].mxu1  ;;  %v245_v22 = vadd.f32 %v1321_v20, %v244_v15 }
 0x128   :  { %v161_v11 = vpop.f32.mrb[2].mxu0  ;;  %v247_v18 = vpop.f32.mrb[2].mxu1 }
 0x129   :  { %v1363_v12 = vpack.c.bf16 %v159_v9, %v159_v9  ;;  %v162_v13 = vadd.f32 %v1314_v7, %v161_v11  ;;  %v1421_v14 = vpop.f32.mrb[3].mxu0  ;;  %v1429_v19 = vpop.f32.mrb[3].mxu1  ;;  %v1885_v27 = vpack.c.bf16 %v245_v22, %v245_v22  ;;  %v248_v28 = vadd.f32 %v1321_v20, %v247_v18 }
 0x12b   :  { %174 = vst.msk [vmem:[#allocation2] sm:$0xf] %vm173_vm2, %v1363_v12  ;;  %v1364_v17 = vpack.c.bf16 %v162_v13, %v162_v13  ;;  %v1890_v30 = vpack.c.bf16 %v248_v28, %v248_v28 }
 0x12d   :  { %175 = vst.msk [vmem:[#allocation2 + $0x4] sm:$0xf] %vm173_vm2, %v1364_v17 }
 0x132   :  { %v257_v21 = vld [vmem:[#allocation2] sm:$0xf] }
 0x133   :  { %v264_v23 = vsel %vm259_vm3, %v257_v21, 0  ;;  %v1888_v29 = vld [vmem:[#allocation2] ss:$0 sps:$4 sm:$0xff]   ;;  %v1330_v43 = vcombine.low %v257_v21, %v257_v21 }
 0x134   :  { %1431 = vmatpush3.bf16.xpose.msra.mxu0 %v264_v23  ;;  %v258_v24 = vld [vmem:[#allocation2 + $0x4] sm:$0xf] }
 0x135   :  { %v310_v25 = vsel %vm259_vm3, %v258_v24, 0  ;;  %v1332_v26 = vcombine.low %v258_v24, %v258_v24  ;;  %1442 = vmatprep.subr.bf16.mxu0 %v1727_v0  ;;  %v1563_v56 = vld [vmem:[#allocation2 + $0x4] ss:$0 sps:$4 sm:$0xff]  }
 0x136   :  { %1437 = vmatpush3.bf16.xpose.msra.mxu1 %v310_v25 }
 0x137   :  { %431 = vrot.lane.b32.xlu1 %v1332_v26, %s1729_s5  ;;  %1448 = vmatprep.subr.bf16.mxu1 %v1727_v0 }
 0x13b   :  { %1433 = vmatmul.mubr.msk.bf16.vlgmr.msra.gmra.mrb[4].mxu0 %vm259_vm3, %v1885_v27  ;;  %491 = vrot.lane.b32.xlu1 %v1888_v29, %s1730_s3 }
 0x13c   :  { %1444 = vmatprep.mubr.msk.bf16.mxu0 %vm1728_vm0, %v1727_v0 }
 0x13d   :  { %1439 = vmatmul.mubr.msk.bf16.vlgmr.msra.gmra.mrb[4].mxu1 %vm259_vm3, %v1890_v30 }
 0x13e   :  { %1450 = vmatprep.mubr.msk.bf16.mxu1 %vm1728_vm0, %v1727_v0 }
 0x1a9   :  { %v432_v31 = vpop.permute.xlu1 %431 }
 0x1aa   :  { %v437_v32 = vsel %vm384_vm4, %v432_v31, 0  ;;  %v1933_v31 = vld [vmem:[#allocation2] ss:$0 sps:$4 sm:$0xff]  }
 0x1ab   :  { %1449 = vmatpush3.bf16.msra.mxu1 %v437_v32  ;;  %v1936_v32 = vld [vmem:[#allocation2 + $0x4] ss:$0 sps:$4 sm:$0xff]  }
 0x1ac   :  { %1460 = vmatprep.subr.bf16.mxu1 %v1727_v0 }
 0x1ad   :  { %v492_v57 = vpop.permute.xlu1 %491 }
 0x1ae   :  { %v497_v1 = vsel %vm259_vm3, %v492_v57, 0 }
 0x20e   :  { %v300_v33 = vpop.f32.mrb[4].mxu0 }
 0x20f   :  { %v1434_v34 = vpop.f32.mrb[5].mxu0  ;;  %v352_v35 = vsel %vm259_vm3, %v300_v33, -inf }
 0x210   :  { %v346_v36 = vpop.f32.mrb[4].mxu1  ;;  %353 = vmax.xlane.f32.xlu0 %v352_v35  ;;  %v303_v37 = vpop.f32.mrb[6].mxu0 }
 0x211   :  { %v1435_v38 = vpop.f32.mrb[7].mxu0  ;;  %v1440_v39 = vpop.f32.mrb[5].mxu1  ;;  %v355_v42 = vsel %vm259_vm3, %v346_v36, -inf }
 0x212   :  { %v349_v40 = vpop.f32.mrb[6].mxu1 }
 0x213   :  { %v1441_v41 = vpop.f32.mrb[7].mxu1 }
 0x214   :  { %356 = vmax.xlane.f32.xlu0 %v355_v42 }
 0x22a   :  { %379 = vrot.lane.b32.xlu0 %v1330_v43, %s1729_s5 }
 0x22e   :  { %486 = vrot.lane.b32.xlu0 %v1885_v27, %s1730_s3 }
 0x29d   :  { %v354_v44 = vpop.xlane.xlu0 %353 }
 0x29e   :  { %v358_v45 = vsub.f32 %v300_v33, %v354_v44 }
 0x2a0   :  { %v360_v46 = vmul.f32 1.442695, %v358_v45 }
 0x2a1   :  { %v357_v47 = vpop.xlane.xlu0 %356 }
 0x2a2   :  { %1571 = vpow2.f32 %v360_v46  ;;  %v359_v48 = vsub.f32 %v346_v36, %v357_v47 }
 0x2a4   :  { %v362_v49 = vmul.f32 1.442695, %v359_v48 }
 0x2a5   :  { %v380_v50 = vpop.permute.xlu0 %379 }
 0x2a6   :  { %1573 = vpow2.f32 %v362_v49  ;;  %v386_v51 = vsel %vm384_vm4, %v380_v50, 0 }
 0x2a7   :  { %1443 = vmatpush3.bf16.msra.mxu0 %v386_v51 }
 0x2a8   :  { %1454 = vmatprep.subr.bf16.mxu0 %v1727_v0 }
 0x2a9   :  { %v487_v6 = vpop.permute.xlu0 %486 }
 0x2ac   :  { %v1572_v52 = vpop.eup %1571 }
 0x2ad   :  { %v364_v53 = vsel %vm259_vm3, %v1572_v52, 0.0 }
 0x2ae   :  { %365 = vadd.xlane.f32.xlu1 %v364_v53 }
 0x2b0   :  { %v1574_v54 = vpop.eup %1573 }
 0x2b1   :  { %v367_v55 = vsel %vm259_vm3, %v1574_v54, 0.0 }
 0x2b2   :  { %368 = vadd.xlane.f32.xlu1 %v367_v55 }
 0x2c3   :  { %544 = vrot.lane.b32.xlu1 %v1563_v56, %s1730_s3 }
 0x2c7   :  { %539 = vrot.lane.b32.xlu1 %v1890_v30, %s1730_s3 }
 0x33b   :  { %v366_v58 = vpop.xlane.xlu1 %365 }
 0x33c   :  { %1575 = vrcp.f32 %v366_v58 }
 0x33f   :  { %v369_v59 = vpop.xlane.xlu1 %368 }
 0x340   :  { %1577 = vrcp.f32 %v369_v59 }
 0x343   :  { %v545_v3 = vpop.permute.xlu1 %544 }
 0x344   :  { %v550_v5 = vsel %vm259_vm3, %v545_v3, 0 }
 0x346   :  { %v1576_v60 = vpop.eup %1575 }
 0x347   :  { %v372_v61 = vmul.f32 %v1576_v60, %v1572_v52  ;;  %v540_v7 = vpop.permute.xlu1 %539 }
 0x349   :  { %v374_v62 = vpack.c.bf16 %v372_v61, %v372_v61 }
 0x34a   :  { %v1578_v63 = vpop.eup %1577 }
 0x34b   :  { %v373_v2 = vmul.f32 %v1578_v63, %v1574_v54  ;;  %1445 = vmatmul.mubr.msk.bf16.vlgmr.msra.gmra.mrb[8].mxu0 %vm259_vm3, %v374_v62 }
 0x34c   :  { %1455 = vmatpush3.bf16.xpose.msra.mxu0 %v497_v1  ;;  %1456 = vmatprep.mubr.msk.bf16.mxu0 %vm1728_vm0, %v1727_v0 }
 0x34d   :  { %v375_v4 = vpack.c.bf16 %v373_v2, %v373_v2  ;;  %1466 = vmatprep.subr.bf16.mxu0 %v1727_v0 }
 0x34f   :  { %1451 = vmatmul.mubr.msk.bf16.vlgmr.msra.gmra.mrb[8].mxu1 %vm259_vm3, %v375_v4 }
 0x350   :  { %1461 = vmatpush3.bf16.xpose.msra.mxu1 %v550_v5  ;;  %1462 = vmatprep.mubr.msk.bf16.mxu1 %vm1728_vm0, %v1727_v0 }
 0x351   :  { %1472 = vmatprep.subr.bf16.mxu1 %v1727_v0 }
 0x353   :  { %1457 = vmatmul.mubr.msk.bf16.vlgmr.msra.gmra.mrb[12].mxu0 %vm259_vm3, %v487_v6 }
 0x354   :  { %1468 = vmatprep.mubr.msk.bf16.mxu0 %vm1728_vm0, %v1727_v0 }
 0x357   :  { %1463 = vmatmul.mubr.msk.bf16.vlgmr.msra.gmra.mrb[12].mxu1 %vm259_vm3, %v540_v7 }
 0x358   :  { %1474 = vmatprep.mubr.msk.bf16.mxu1 %vm1728_vm0, %v1727_v0 }
 0x41e   :  { %v422_v8 = vpop.f32.mrb[8].mxu0 }
 0x41f   :  { %v479_v9 = vpack.c.bf16 %v422_v8, %v422_v8  ;;  %v1446_v10 = vpop.f32.mrb[9].mxu0 }
 0x420   :  { %v425_v11 = vpop.f32.mrb[10].mxu0 }
 0x421   :  { %482 = vst.msk [vmem:[#allocation3] sm:$0xf] %vm481_vm5, %v479_v9  ;;  %v1447_v12 = vpop.f32.mrb[11].mxu0 }
 0x422   :  { %v473_v13 = vpop.f32.mrb[8].mxu1 }
 0x423   :  { %v480_v14 = vpack.c.bf16 %v473_v13, %v473_v13  ;;  %v1452_v15 = vpop.f32.mrb[9].mxu1 }
 0x424   :  { %v476_v16 = vpop.f32.mrb[10].mxu1  ;;  %v1971_v15 = vld [vmem:[#allocation2] ss:$0 sps:$4 sm:$0xff]  }
 0x425   :  { %483 = vst.msk [vmem:[#allocation3 + $0x4] sm:$0xf] %vm481_vm5, %v480_v14  ;;  %v1453_v17 = vpop.f32.mrb[11].mxu1  ;;  %v1974_v16 = vld [vmem:[#allocation2 + $0x4] ss:$0 sps:$4 sm:$0xff]  }
 0x426   :  { %v533_v18 = vpop.f32.mrb[12].mxu0 }
 0x427   :  { %v1458_v19 = vpop.f32.mrb[13].mxu0  ;;  %v592_v20 = vsel %vm259_vm3, %v533_v18, -inf }
 0x428   :  { %593 = vmax.xlane.f32.xlu0 %v592_v20  ;;  %v536_v21 = vpop.f32.mrb[14].mxu0 }
 0x429   :  { %v1459_v22 = vpop.f32.mrb[15].mxu0 }
 0x42a   :  { %v586_v23 = vpop.f32.mrb[12].mxu1 }
 0x42b   :  { %v1464_v24 = vpop.f32.mrb[13].mxu1  ;;  %v595_v25 = vsel %vm259_vm3, %v586_v23, -inf }
 0x42c   :  { %596 = vmax.xlane.f32.xlu1 %v595_v25  ;;  %v589_v26 = vpop.f32.mrb[14].mxu1 }
 0x42d   :  { %v1465_v28 = vpop.f32.mrb[15].mxu1 }
 0x43d   :  { %664 = vrot.lane.b32.xlu1 %v1563_v56, %s1731_s11 }
 0x441   :  { %736 = vrot.lane.b32.xlu1 %v1933_v31, %s1732_s12 }
 0x445   :  { %789 = vrot.lane.b32.xlu1 %v1936_v32, %s1732_s12 }
 0x449   :  { %784 = vrot.lane.b32.xlu1 %v1890_v30, %s1732_s12 }
 0x4b5   :  { %v594_v33 = vpop.xlane.xlu0 %593 }
 0x4b6   :  { %v598_v34 = vsub.f32 %v533_v18, %v594_v33 }
 0x4b8   :  { %v600_v35 = vmul.f32 1.442695, %v598_v34 }
 0x4b9   :  { %v597_v36 = vpop.xlane.xlu1 %596 }
 0x4ba   :  { %1579 = vpow2.f32 %v600_v35  ;;  %v599_v37 = vsub.f32 %v586_v23, %v597_v36 }
 0x4bc   :  { %v602_v38 = vmul.f32 1.442695, %v599_v37 }
 0x4bd   :  { %v665_v39 = vpop.permute.xlu1 %664 }
 0x4be   :  { %1581 = vpow2.f32 %v602_v38  ;;  %v670_v40 = vsel %vm384_vm4, %v665_v39, 0 }
 0x4bf   :  { %1473 = vmatpush3.bf16.msra.mxu1 %v670_v40 }
 0x4c0   :  { %1484 = vmatprep.subr.bf16.mxu1 %v1727_v0 }
 0x4c1   :  { %v737_v50 = vpop.permute.xlu1 %736 }
 0x4c2   :  { %v742_v55 = vsel %vm259_vm3, %v737_v50, 0 }
 0x4c4   :  { %v1580_v41 = vpop.eup %1579 }
 0x4c5   :  { %v604_v42 = vsel %vm259_vm3, %v1580_v41, 0.0 }
 0x4c6   :  { %605 = vadd.xlane.f32.xlu0 %v604_v42 }
 0x4c8   :  { %v1582_v43 = vpop.eup %1581 }
 0x4c9   :  { %v607_v44 = vsel %vm259_vm3, %v1582_v43, 0.0 }
 0x4ca   :  { %608 = vadd.xlane.f32.xlu0 %v607_v44 }
 0x4e0   :  { %616 = vrot.lane.b32.xlu0 %v1888_v29, %s1731_s11  ;;  %v790_v29 = vpop.permute.xlu1 %789 }
 0x4e1   :  { %v795_v57 = vsel %vm259_vm3, %v790_v29, 0 }
 0x4e4   :  { %731 = vrot.lane.b32.xlu0 %v1885_v27, %s1732_s12  ;;  %v785_v59 = vpop.permute.xlu1 %784 }
 0x553   :  { %v606_v45 = vpop.xlane.xlu0 %605 }
 0x554   :  { %1583 = vrcp.f32 %v606_v45 }
 0x557   :  { %v609_v46 = vpop.xlane.xlu0 %608 }
 0x558   :  { %1585 = vrcp.f32 %v609_v46 }
 0x55b   :  { %v617_v47 = vpop.permute.xlu0 %616 }
 0x55c   :  { %v622_v48 = vsel %vm384_vm4, %v617_v47, 0 }
 0x55d   :  { %1467 = vmatpush3.bf16.msra.mxu0 %v622_v48 }
 0x55e   :  { %v1584_v49 = vpop.eup %1583  ;;  %1478 = vmatprep.subr.bf16.mxu0 %v1727_v0 }
 0x55f   :  { %v612_v51 = vmul.f32 %v1584_v49, %v1580_v41  ;;  %v732_v58 = vpop.permute.xlu0 %731 }
 0x561   :  { %v614_v52 = vpack.c.bf16 %v612_v51, %v612_v51 }
 0x562   :  { %v1586_v53 = vpop.eup %1585 }
 0x563   :  { %v613_v54 = vmul.f32 %v1586_v53, %v1582_v43  ;;  %1469 = vmatmul.mubr.msk.bf16.vlgmr.msra.gmra.mrb[16].mxu0 %vm259_vm3, %v614_v52 }
 0x564   :  { %1480 = vmatprep.mubr.msk.bf16.mxu0 %vm1728_vm0, %v1727_v0 }
 0x565   :  { %v615_v56 = vpack.c.bf16 %v613_v54, %v613_v54 }
 0x566   :  { %1479 = vmatpush3.bf16.xpose.msra.mxu0 %v742_v55 }
 0x567   :  { %1475 = vmatmul.mubr.msk.bf16.vlgmr.msra.gmra.mrb[16].mxu1 %vm259_vm3, %v615_v56  ;;  %1490 = vmatprep.subr.bf16.mxu0 %v1727_v0 }
 0x568   :  { %1485 = vmatpush3.bf16.xpose.msra.mxu1 %v795_v57  ;;  %1486 = vmatprep.mubr.msk.bf16.mxu1 %vm1728_vm0, %v1727_v0 }
 0x569   :  { %1496 = vmatprep.subr.bf16.mxu1 %v1727_v0 }
 0x56d   :  { %1481 = vmatmul.mubr.msk.bf16.vlgmr.msra.gmra.mrb[20].mxu0 %vm259_vm3, %v732_v58 }
 0x56e   :  { %1492 = vmatprep.mubr.msk.bf16.mxu0 %vm1728_vm0, %v1727_v0 }
 0x56f   :  { %1487 = vmatmul.mubr.msk.bf16.vlgmr.msra.gmra.mrb[20].mxu1 %vm259_vm3, %v785_v59 }
 0x570   :  { %1498 = vmatprep.mubr.msk.bf16.mxu1 %vm1728_vm0, %v1727_v0 }
 0x636   :  { %v1964_v60 = vpop.f32.mrb[16].mxu0 }
 0x637   :  { %v1470_v61 = vpop.f32.mrb[17].mxu0 }
 0x638   :  { %v661_v62 = vpop.f32.mrb[18].mxu0 }
 0x639   :  { %v1471_v63 = vpop.f32.mrb[19].mxu0 }
 0x63a   :  { %v1966_v1 = vpop.f32.mrb[16].mxu1 }
 0x63b   :  { %v1476_v2 = vpop.f32.mrb[17].mxu1 }
 0x63c   :  { %v709_v3 = vpop.f32.mrb[18].mxu1  ;;  %v1367_v2 = vpack.c.bf16 %v1964_v60, %v1964_v60 }
 0x63d   :  { %v1477_v4 = vpop.f32.mrb[19].mxu1  ;;  %v1368_v3 = vpack.c.bf16 %v1966_v1, %v1966_v1 }
 0x640   :  { %v778_v5 = vpop.f32.mrb[20].mxu0 }
 0x641   :  { %v1482_v6 = vpop.f32.mrb[21].mxu0  ;;  %v837_v7 = vsel %vm259_vm3, %v778_v5, -inf }
 0x642   :  { %v831_v8 = vpop.f32.mrb[20].mxu1  ;;  %838 = vmax.xlane.f32.xlu0 %v837_v7  ;;  %v781_v9 = vpop.f32.mrb[22].mxu0 }
 0x643   :  { %v1483_v10 = vpop.f32.mrb[23].mxu0  ;;  %v1488_v11 = vpop.f32.mrb[21].mxu1  ;;  %v840_v12 = vsel %vm259_vm3, %v831_v8, -inf }
 0x644   :  { %841 = vmax.xlane.f32.xlu1 %v840_v12  ;;  %v834_v13 = vpop.f32.mrb[22].mxu1 }
 0x645   :  { %v1489_v14 = vpop.f32.mrb[23].mxu1 }
 0x655   :  { %909 = vrot.lane.b32.xlu1 %v1936_v32, %s1733_s13 }
 0x659   :  { %981 = vrot.lane.b32.xlu1 %v1971_v15, %s1734_s14 }
 0x65d   :  { %1034 = vrot.lane.b32.xlu1 %v1974_v16, %s1734_s14 }
 0x661   :  { %1029 = vrot.lane.b32.xlu1 %v1890_v30, %s1734_s14 }
 0x6cf   :  { %v839_v17 = vpop.xlane.xlu0 %838 }
 0x6d0   :  { %v843_v18 = vsub.f32 %v778_v5, %v839_v17 }
 0x6d1   :  { %v842_v19 = vpop.xlane.xlu1 %841 }
 0x6d2   :  { %v845_v20 = vmul.f32 1.442695, %v843_v18  ;;  %v844_v21 = vsub.f32 %v831_v8, %v842_v19 }
 0x6d4   :  { %1587 = vpow2.f32 %v845_v20  ;;  %v847_v22 = vmul.f32 1.442695, %v844_v21 }
 0x6d5   :  { %v910_v23 = vpop.permute.xlu1 %909 }
 0x6d6   :  { %1589 = vpow2.f32 %v847_v22  ;;  %v915_v24 = vsel %vm384_vm4, %v910_v23, 0 }
 0x6d7   :  { %1497 = vmatpush3.bf16.msra.mxu1 %v915_v24 }
 0x6d8   :  { %1508 = vmatprep.subr.bf16.mxu1 %v1727_v0 }
 0x6d9   :  { %v982_v37 = vpop.permute.xlu1 %981 }
 0x6de   :  { %v1588_v25 = vpop.eup %1587 }
 0x6df   :  { %v849_v26 = vsel %vm259_vm3, %v1588_v25, 0.0 }
 0x6e0   :  { %v1590_v28 = vpop.eup %1589  ;;  %850 = vadd.xlane.f32.xlu0 %v849_v26 }
 0x6e1   :  { %v852_v30 = vsel %vm259_vm3, %v1590_v28, 0.0 }
 0x6e4   :  { %853 = vadd.xlane.f32.xlu0 %v852_v30 }
 0x6fa   :  { %861 = vrot.lane.b32.xlu0 %v1933_v31, %s1733_s13  ;;  %v1035_v31 = vpop.permute.xlu1 %1034 }
 0x6fb   :  { %v1040_v43 = vsel %vm259_vm3, %v1035_v31, 0 }
 0x6fe   :  { %976 = vrot.lane.b32.xlu0 %v1885_v27, %s1734_s14  ;;  %v987_v27 = vsel %vm259_vm3, %v982_v37, 0  ;;  %v1030_v45 = vpop.permute.xlu1 %1029 }
 0x76d   :  { %v851_v32 = vpop.xlane.xlu0 %850 }
 0x76e   :  { %1591 = vrcp.f32 %v851_v32 }
 0x771   :  { %v854_v33 = vpop.xlane.xlu0 %853 }
 0x772   :  { %1593 = vrcp.f32 %v854_v33  ;;  %v1568_v33 = vld [vmem:[%s2057_s6] sm:$0xff]  }
 0x775   :  { %v862_v34 = vpop.permute.xlu0 %861 }
 0x776   :  { %v867_v35 = vsel %vm384_vm4, %v862_v34, 0  ;;  %v1569_v34 = vld [vmem:[%s2057_s6 + $0x8] sm:$0xff]  }
 0x777   :  { %1491 = vmatpush3.bf16.msra.mxu0 %v867_v35 }
 0x778   :  { %v1592_v36 = vpop.eup %1591  ;;  %1502 = vmatprep.subr.bf16.mxu0 %v1727_v0 }
 0x779   :  { %v857_v38 = vmul.f32 %v1592_v36, %v1588_v25  ;;  %v977_v44 = vpop.permute.xlu0 %976 }
 0x77b   :  { %v859_v39 = vpack.c.bf16 %v857_v38, %v857_v38 }
 0x77c   :  { %v1594_v40 = vpop.eup %1593 }
 0x77d   :  { %v858_v41 = vmul.f32 %v1594_v40, %v1590_v28  ;;  %1493 = vmatmul.mubr.msk.bf16.vlgmr.msra.gmra.mrb[24].mxu0 %vm259_vm3, %v859_v39 }
 0x77e   :  { %1504 = vmatprep.mubr.msk.bf16.mxu0 %vm1728_vm0, %v1727_v0 }
 0x77f   :  { %v860_v42 = vpack.c.bf16 %v858_v41, %v858_v41 }
 0x780   :  { %1503 = vmatpush3.bf16.xpose.msra.mxu0 %v987_v27 }
 0x781   :  { %1499 = vmatmul.mubr.msk.bf16.vlgmr.msra.gmra.mrb[24].mxu1 %vm259_vm3, %v860_v42  ;;  %1514 = vmatprep.subr.bf16.mxu0 %v1727_v0 }
 0x782   :  { %1509 = vmatpush3.bf16.xpose.msra.mxu1 %v1040_v43  ;;  %1510 = vmatprep.mubr.msk.bf16.mxu1 %vm1728_vm0, %v1727_v0 }
 0x783   :  { %1520 = vmatprep.subr.bf16.mxu1 %v1727_v0 }
 0x787   :  { %1505 = vmatmul.mubr.msk.bf16.vlgmr.msra.gmra.mrb[28].mxu0 %vm259_vm3, %v977_v44 }
 0x788   :  { %1516 = vmatprep.mubr.msk.bf16.mxu0 %vm1728_vm0, %v1727_v0 }
 0x789   :  { %1511 = vmatmul.mubr.msk.bf16.vlgmr.msra.gmra.mrb[28].mxu1 %vm259_vm3, %v1030_v45  ;;  %v1358_v45 = vld [vmem:[%s2058_s7] ss:$0 sm:$0xff] }
 0x78a   :  { %1522 = vmatprep.mubr.msk.bf16.mxu1 %vm1728_vm0, %v1727_v0 }
 0x850   :  { %v903_v46 = vpop.f32.mrb[24].mxu0 }
 0x851   :  { %v1494_v47 = vpop.f32.mrb[25].mxu0  ;;  %v1369_v19 = vpack.c.bf16 %v903_v46, %v903_v46 }
 0x852   :  { %v906_v48 = vpop.f32.mrb[26].mxu0 }
 0x853   :  { %v1495_v49 = vpop.f32.mrb[27].mxu0 }
 0x854   :  { %v951_v50 = vpop.f32.mrb[24].mxu1 }
 0x855   :  { %v1500_v51 = vpop.f32.mrb[25].mxu1  ;;  %v1370_v4 = vpack.c.bf16 %v951_v50, %v951_v50 }
 0x856   :  { %v954_v52 = vpop.f32.mrb[26].mxu1 }
 0x857   :  { %v1501_v53 = vpop.f32.mrb[27].mxu1 }
 0x85a   :  { %v1023_v54 = vpop.f32.mrb[28].mxu0 }
 0x85b   :  { %v1506_v29 = vpop.f32.mrb[29].mxu0  ;;  %v1082_v55 = vsel %vm259_vm3, %v1023_v54, -inf }
 0x85c   :  { %v1076_v56 = vpop.f32.mrb[28].mxu1  ;;  %1083 = vmax.xlane.f32.xlu0 %v1082_v55  ;;  %v1026_v57 = vpop.f32.mrb[30].mxu0 }
 0x85d   :  { %v1507_v58 = vpop.f32.mrb[31].mxu0  ;;  %v1512_v59 = vpop.f32.mrb[29].mxu1  ;;  %v1085_v61 = vsel %vm259_vm3, %v1076_v56, -inf }
 0x85e   :  { %1086 = vmax.xlane.f32.xlu1 %v1085_v61  ;;  %v1079_v62 = vpop.f32.mrb[30].mxu1 }
 0x85f   :  { %v1513_v63 = vpop.f32.mrb[31].mxu1 }
 0x86f   :  { %1154 = vrot.lane.b32.xlu1 %v1974_v16, %s1735_s15 }
 0x873   :  { %720 = vrot.lane.b32.xlu1 %v1367_v2, %s1736_s16 }
 0x877   :  { %722 = vrot.lane.b32.xlu1 %v1368_v3, %s1736_s16 }
 0x87b   :  { %967 = vrot.lane.b32.xlu1 %v1370_v4, %s1737_s19 }
 0x8e9   :  { %v1084_v5 = vpop.xlane.xlu0 %1083 }
 0x8ea   :  { %v1088_v6 = vsub.f32 %v1023_v54, %v1084_v5 }
 0x8eb   :  { %v1087_v7 = vpop.xlane.xlu1 %1086 }
 0x8ec   :  { %v1090_v8 = vmul.f32 1.442695, %v1088_v6  ;;  %v1089_v9 = vsub.f32 %v1076_v56, %v1087_v7 }
 0x8ee   :  { %1595 = vpow2.f32 %v1090_v8  ;;  %v1092_v10 = vmul.f32 1.442695, %v1089_v9 }
 0x8ef   :  { %v1155_v11 = vpop.permute.xlu1 %1154 }
 0x8f0   :  { %1597 = vpow2.f32 %v1092_v10  ;;  %v1160_v60 = vsel %vm384_vm4, %v1155_v11, 0 }
 0x8f1   :  { %1521 = vmatpush3.bf16.msra.mxu1 %v1160_v60 }
 0x8f3   :  { %v721_v12 = vpop.permute.xlu1 %720 }
 0x8f4   :  { %727 = vst.msk [vmem:[#allocation3] sm:$0xf] %vm726_vm6, %v721_v12 }
 0x8f7   :  { %v723_v1 = vpop.permute.xlu1 %722 }
 0x8f8   :  { %v1596_v13 = vpop.eup %1595  ;;  %728 = vst.msk [vmem:[#allocation3 + $0x4] sm:$0xf] %vm726_vm6, %v723_v1 }
 0x8f9   :  { %v1094_v14 = vsel %vm259_vm3, %v1596_v13, 0.0 }
 0x8fa   :  { %v1598_v16 = vpop.eup %1597  ;;  %1095 = vadd.xlane.f32.xlu0 %v1094_v14 }
 0x8fb   :  { %v968_v17 = vpop.permute.xlu1 %967  ;;  %v1097_v18 = vsel %vm259_vm3, %v1598_v16, 0.0 }
 0x8fc   :  { %973 = vst.msk [vmem:[#allocation3 + $0x4] sm:$0xf] %vm971_vm7, %v968_v17 }
 0x8fe   :  { %1098 = vadd.xlane.f32.xlu0 %v1097_v18 }
 0x914   :  { %1106 = vrot.lane.b32.xlu0 %v1971_v15, %s1735_s15 }
 0x918   :  { %965 = vrot.lane.b32.xlu0 %v1369_v19, %s1737_s19 }
 0x987   :  { %v1096_v20 = vpop.xlane.xlu0 %1095 }
 0x988   :  { %1599 = vrcp.f32 %v1096_v20 }
 0x98b   :  { %v1099_v21 = vpop.xlane.xlu0 %1098 }
 0x98c   :  { %1601 = vrcp.f32 %v1099_v21 }
 0x98f   :  { %v1107_v22 = vpop.permute.xlu0 %1106 }
 0x990   :  { %v1112_v23 = vsel %vm384_vm4, %v1107_v22, 0 }
 0x991   :  { %1515 = vmatpush3.bf16.msra.mxu0 %v1112_v23 }
 0x992   :  { %v1600_v24 = vpop.eup %1599  ;;  %1526 = vmatprep.subr.bf16.mxu0 %v1727_v0 }
 0x993   :  { %v1102_v25 = vmul.f32 %v1600_v24, %v1596_v13  ;;  %v966_v26 = vpop.permute.xlu0 %965 }
 0x994   :  { %972 = vst.msk [vmem:[#allocation3] sm:$0xf] %vm971_vm7, %v966_v26 }
 0x995   :  { %v1104_v28 = vpack.c.bf16 %v1102_v25, %v1102_v25 }
 0x996   :  { %v1602_v30 = vpop.eup %1601 }
 0x997   :  { %v1103_v15 = vmul.f32 %v1602_v30, %v1598_v16  ;;  %1517 = vmatmul.mubr.msk.bf16.vlgmr.msra.gmra.mrb[32].mxu0 %vm259_vm3, %v1104_v28 }
 0x998   :  { %1530 = vmatprep.mubr.msk.bf16.mxu0 %vm1728_vm0, %v1727_v0  ;;  %1527 = vmatpush3.bf16.msra.mxu0 %v1568_v33 }
 0x999   :  { %v1105_v32 = vpack.c.bf16 %v1103_v15, %v1103_v15  ;;  %1528 = vmatprep.subr.bf16.mxu0 %v1727_v0 }
 0x99b   :  { %1523 = vmatmul.mubr.msk.bf16.vlgmr.msra.gmra.mrb[32].mxu1 %vm259_vm3, %v1105_v32 }
 0x99c   :  { %1529 = vmatpush3.bf16.msra.mxu0 %v1569_v34 }
 0xa6a   :  { %v1148_v35 = vpop.f32.mrb[32].mxu0 }
 0xa6b   :  { %v1371_v36 = vpack.c.bf16 %v1148_v35, %v1148_v35  ;;  %v1518_v37 = vpop.f32.mrb[33].mxu0 }
 0xa6c   :  { %v1151_v38 = vpop.f32.mrb[34].mxu0 }
 0xa6d   :  { %1210 = vrot.lane.b32.xlu0 %v1371_v36, %s1738_s22  ;;  %v1519_v39 = vpop.f32.mrb[35].mxu0 }
 0xa6e   :  { %v1196_v40 = vpop.f32.mrb[32].mxu1 }
 0xa6f   :  { %v1372_v41 = vpack.c.bf16 %v1196_v40, %v1196_v40  ;;  %v1524_v31 = vpop.f32.mrb[33].mxu1 }
 0xa70   :  { %v1199_v27 = vpop.f32.mrb[34].mxu1 }
 0xa71   :  { %1212 = vrot.lane.b32.xlu1 %v1372_v41, %s1738_s22  ;;  %v1525_v42 = vpop.f32.mrb[35].mxu1 }
 0xadf   :  { %v1211_v43 = vpop.permute.xlu0 %1210 }
 0xae0   :  { %1217 = vst.msk [vmem:[#allocation3] sm:$0xf] %vm1216_vm8, %v1211_v43 }
 0xae3   :  { %v1213_v44 = vpop.permute.xlu1 %1212 }
 0xae4   :  { %1218 = vst.msk [vmem:[#allocation3 + $0x4] sm:$0xf] %vm1216_vm8, %v1213_v44 }
 0xaeb   :  { %v1570_v0 = vld [vmem:[#allocation3] sm:$0xff]  }
 0xaec   :  { %1531 = vmatmul.mubr.msk.bf16.vlgmr.msra.gmra.mrb[36].mxu0 %vm120_vm1, %v1570_v0 }
 0xbbf   :  { %v1286_v46 = vpop.f32.mrb[36].mxu0 }
 0xbc0   :  { %v1287_v47 = vadd.f32 %v1358_v45, %v1286_v46  ;;  %v1532_v48 = vpop.f32.mrb[37].mxu0 }
 0xbc1   :  { %v1289_v49 = vpop.f32.mrb[38].mxu0 }
 0xbc2   :  { %1293 = vst.msk [vmem:[#allocation12] sm:$0xff] %vm120_vm1, %v1287_v47  ;;  %v1290_v50 = vadd.f32 %v1358_v45, %v1289_v49  ;;  %v1533_v51 = vpop.f32.mrb[39].mxu0 }
 0xbc4   :  { %1294 = vst.msk [vmem:[#allocation12 + $0x8] sm:$0xff] %vm120_vm1, %v1290_v50 }
 0xbc5   :  { %1702 = shalt.err (!%p1699_p8)
}
 0xbc6   :  { %s1703_s29 = scalar_lea.hbm %s2059_s8, 256 }
 0xbc7   :  { %p1704_p9 = scmp.ne.s32.totalorder %s2059_s8, %s1703_s29  ;;  %p1707_p10 = scmp.lt.u32.totalorder %s1703_s29, %s2059_s8 }
 0xbc9   :  { %p1709_p11 = pnand %p1707_p10, %p1704_p9 }
 0xbcb   :  { %1712 = shalt.err (!%p1709_p11)
}
 0xbcc   :  { %s1740_s4 = smov 128  }
 0xbcd   :  { %1306 = dma.vmem_to_hbm [thread:$0]  %s1301_s25, 256, %s2059_s8, [#allocation6], %s1740_s4, %s1740_s4, %s1736_s16  }
 0xbce   :  { %1719 = dma.done.wait [#allocation6], 256  }
 0xbcf   :  { %1720 = vsyncadd [#allocation6], 4294967040 }
 0xbd0   :  { %1310 = vsyncpa [#allocation5], 1 }
 0xbd1   :  { %1311 = vsyncpa [#allocation8], 1 }
 0xbd2   :  { %1312 = vsyncpa [#allocation11], 1 }
 0xbd3   :  { %1313 = vsyncpa [#allocation6], 1 }

</bundles_post_ra>
